<compile_context>
chip_gen: v7x
topology: tpu7x:2x2x1
jax: 0.10.0
libtpu: 0.0.40
codegen_flags: <defaults>
</compile_context>

<pallas_src>
import functools
import numpy as np
import jax
import jax.numpy as jnp
from jax.experimental import pallas as pl
from jax.experimental.pallas import tpu as pltpu

# ---- small config consistent with PromptLearner / CustomCLIP.forward ----
M_VIEWS = 4                  # number of augmented views (image.shape[0])
BATCH   = 2                  # b
IMG_C, IMG_H, IMG_W = 3, 16, 16
D_FEAT  = 64                 # joint embedding dim d
N_PROMPT = 2                 # cfg.MODEL.N (prompt ensembles)
N_CLS    = 5                 # number of classes
N_CTX    = 4                 # context tokens
CTX_DIM  = 32                # text transformer width
SEQ_LEN  = 16                # token sequence length (stand-in for CLIP's 77)
SINK_EPS = 0.1
SINK_MAX_ITER = 100
SINK_THRESH = 0.01
SINK_CHECK_EVERY = 5         # convergence test once per 5 unrolled Sinkhorn updates

# packed-constants layout (one lane-padded VMEM input instead of 5 tiny DMAs)
PACK_COLS = max(D_FEAT, CTX_DIM, SEQ_LEN)                          # 64
PACK_ROWS = ((3 + SEQ_LEN + N_PROMPT * N_CLS + 7) // 8) * 8        # 32
OUT_ROWS, OUT_COLS = 8, 128                                        # lane-dense output pad
assert BATCH <= OUT_ROWS and N_CLS <= OUT_COLS


def _vmem():
    return pl.BlockSpec(memory_space=pltpu.MemorySpace.VMEM)


def _smem():
    return pl.BlockSpec(memory_space=pltpu.MemorySpace.SMEM)


# -------------------------------------------------------------------------
# Single fused kernel: image proj + text encode (EOT-first) + normalize +
# similarity + Sinkhorn OT (blocked early exit, MXU-free loop) + logit scale.
# -------------------------------------------------------------------------
def fused_kernel(scale_ref, x_ref, w_img_ref, prompts_ref, proj_ref, pack_ref, out_ref,
                 *, m_views, batch, n_prompt, n_cls, seq_len, ctx_dim,
                 u, v, eps, max_iter, thresh, check_every, out_rows, out_cols):
    f32 = jnp.float32
    M, B, N, C, L, Dc = m_views, batch, n_prompt, n_cls, seq_len, ctx_dim
    R, Q, NC = M * B, N * C, N * C

    # ---- unpack the small-constant block (b_img / pos_emb / ln_w / ln_b / EOT) -------
    pack = pack_ref[...]
    b_img = pack[0:1, :]                                # (1, D)
    pos   = pack[1:1 + L, 0:Dc]                         # (L, Dc)
    ln_w  = pack[1 + L:2 + L, 0:Dc]                     # (1, Dc)
    ln_b  = pack[2 + L:3 + L, 0:Dc]                     # (1, Dc)
    eot   = pack[3 + L:3 + L + NC, 0:L]                 # (NC, L) one-hot of EOT position

    # ---- image encoder stand-in: flatten(NCHW) @ W + b -> (M*B, D) -------------------
    # TODO(synk): clip_model.visual (ViT) not reproduced; linear projection stand-in.
    img = jnp.dot(x_ref[...], w_img_ref[...], preferred_element_type=f32) + b_img

    # ---- text encoder: EOT-select FIRST, then LN + projection on (NC, Dc) only -------
    # TODO(synk): clip_model.transformer (self-attn stack) needs CLIP weights; identity
    # stand-in, so the per-token ln_final commutes with the EOT selection (hoisted).
    x_eot = jnp.sum(prompts_ref[...] * eot[:, :, None], axis=1)        # (NC, Dc)
    x_eot = x_eot + jnp.dot(eot, pos, preferred_element_type=f32)      # + pos_emb @ EOT
    mu = jnp.mean(x_eot, axis=-1, keepdims=True)                       # two-pass LN
    xc = x_eot - mu
    var = jnp.mean(xc * xc, axis=-1, keepdims=True)
    xn = xc * jax.lax.rsqrt(var + 1e-5) * ln_w + ln_b
    txt = jnp.dot(xn, proj_ref[...], preferred_element_type=f32)       # (NC, D)

    # ---- F.normalize(dim=-1): x * rsqrt(max(sum x^2, 1e-24)) -------------------------
    img = img * jax.lax.rsqrt(jnp.maximum(jnp.sum(img * img, -1, keepdims=True), 1e-24))
    txt = txt * jax.lax.rsqrt(jnp.maximum(jnp.sum(txt * txt, -1, keepdims=True), 1e-24))

    # ---- similarity: ONE matmul, kept in 2-D layout (R, Q) = (M*B, N*C) --------------
    sim2 = jax.lax.dot_general(img, txt, (((1,), (1,)), ((), ())),
                               preferred_element_type=f32)
    kmat = jnp.exp((sim2 - 1.0) * (1.0 / eps))          # exp(-(1 - sim)/eps)

    # ---- Sinkhorn loop helpers: tiling + slice/add trees, NO MXU in the loop ---------
    def tile_rows(cm):     # (B, Q) -> (R, Q): row m*B+b <- cm[b]        (was ebt @ c)
        return jnp.concatenate([cm] * M, axis=0)

    def tile_cols(rm):     # (R, C) -> (R, Q): col n*C+c <- rm[:, c]     (was r @ ent)
        return jnp.concatenate([rm] * N, axis=1)

    def group_sum_n(a):    # (R, Q) -> (R, C): sum over prompt sets n    (was a @ en)
        acc = a[:, 0:C]
        for n in range(1, N):
            acc = acc + a[:, n * C:(n + 1) * C]
        return acc

    def group_sum_m(a):    # (R, Q) -> (B, Q): sum over views m          (was eb @ a)
        acc = a[0:B, :]
        for m in range(1, M):
            acc = acc + a[m * B:(m + 1) * B, :]
        return acc

    def sinkhorn_update(r, c, exact):
        kc = group_sum_n(kmat * tile_rows(c))                       # (R, C)  sum_n K*c
        r_new = (u / kc) if exact else u * pl.reciprocal(kc, approx=True)
        kr = group_sum_m(kmat * tile_cols(r_new))                   # (B, Q)  sum_m K*r
        c_new = (v / kr) if exact else v * pl.reciprocal(kr, approx=True)
        return r_new, c_new

    r0 = jnp.ones((R, C), f32)        # r[m,b,c] stored at [m*B+b, c]
    c0 = jnp.ones((B, Q), f32)        # c[n,b,c] stored at [b, n*C+c]

    def loop_cond(carry):
        it, err, _, _ = carry
        return jnp.logical_and(it < max_iter, err >= thresh)  # torch: break if err<thresh

    def loop_body(carry):
        it, _, r, c = carry
        r_prev = r
        for _ in range(check_every):          # statically unrolled block of updates
            r_prev = r
            r, c = sinkhorn_update(r, c, exact=False)
        err = jnp.mean(jnp.abs(r - r_prev))   # reference metric, amortized 1/K checks
        return it + check_every, err, r, c

    _, _, r, c = jax.lax.while_loop(loop_cond, loop_body,
                                    (jnp.int32(0), jnp.float32(1e30), r0, c0))

    # One exact-division refinement so the returned plan does not carry the ~2^-12
    # approx-reciprocal error of the in-loop updates (review correctness note).
    r, c = sinkhorn_update(r, c, exact=True)

    # ---- T = (r x c) * K;  logits[b, c] = sum_{m, n} T * sim -------------------------
    t_sim = tile_cols(r) * tile_rows(c) * kmat * sim2               # (R, Q)

    # Once-only epilogue group-sum via in-kernel iota selectors: produces the result
    # directly as a lane-dense (out_rows, out_cols) block -> unmasked vst.
    ro = jax.lax.broadcasted_iota(jnp.int32, (out_rows, R), 0)
    rs = jax.lax.broadcasted_iota(jnp.int32, (out_rows, R), 1)
    eb_acc = rs == ro
    for m in range(1, M):
        eb_acc = jnp.logical_or(eb_acc, rs == (m * B + ro))
    eb_pad = jnp.logical_and(eb_acc, ro < B).astype(f32)            # (out_rows, R)

    qs = jax.lax.broadcasted_iota(jnp.int32, (Q, out_cols), 0)
    co = jax.lax.broadcasted_iota(jnp.int32, (Q, out_cols), 1)
    en_acc = qs == co
    for n in range(1, N):
        en_acc = jnp.logical_or(en_acc, qs == (n * C + co))
    en_pad = jnp.logical_and(en_acc, co < C).astype(f32)            # (Q, out_cols)

    logits_pad = jnp.dot(jnp.dot(eb_pad, t_sim, preferred_element_type=f32),
                         en_pad, preferred_element_type=f32)        # (out_rows, out_cols)
    out_ref[...] = scale_ref[0, 0] * logits_pad                     # logit_scale.exp()*OT


# -------------------------------------------------------------------------
# Wrapper: PromptLearner.forward (prompt assembly) + EOT one-hot + constant
# packing are one-time XLA glue before the single fused launch.
# -------------------------------------------------------------------------
@jax.jit
def custom_clip_forward(image, params):
    M, B = image.shape[0], image.shape[1]

    # ---- image views flattened for the encoder stand-in ----
    x = image.reshape(M * B, -1).astype(jnp.float32)

    # ---- PromptLearner.forward (class_token_position == 'end') ----
    ctx = params["ctx"]                                                  # (N, n_ctx, dim)
    ctx = jnp.broadcast_to(ctx[None], (N_CLS, N_PROMPT, N_CTX, CTX_DIM))
    ctx = jnp.transpose(ctx, (1, 0, 2, 3)).reshape(N_PROMPT * N_CLS, N_CTX, CTX_DIM)
    prompts = jnp.concatenate(
        [params["token_prefix"], ctx, params["token_suffix"]], axis=1)   # (NC, L, dim)

    # ---- EOT one-hot (tokenized_prompts.argmax(-1)), computed once ----
    eot_idx = jnp.argmax(params["tokenized_prompts"], axis=-1)           # (NC,)
    eot_onehot = jax.nn.one_hot(eot_idx, SEQ_LEN, dtype=jnp.float32)

    # torch: logit_scale.exp() — single scalar op here; kernel only multiplies.
    scale = jnp.exp(params["logit_scale"]).reshape(1, 1).astype(jnp.float32)

    # ---- pack the small constants into ONE lane-padded VMEM input ----
    NC = N_PROMPT * N_CLS
    pack = jnp.zeros((PACK_ROWS, PACK_COLS), jnp.float32)
    pack = pack.at[0, :D_FEAT].set(params["b_img"][0])
    pack = pack.at[1:1 + SEQ_LEN, :CTX_DIM].set(params["pos_emb"])
    pack = pack.at[1 + SEQ_LEN, :CTX_DIM].set(params["ln_w"][0])
    pack = pack.at[2 + SEQ_LEN, :CTX_DIM].set(params["ln_b"][0])
    pack = pack.at[3 + SEQ_LEN:3 + SEQ_LEN + NC, :SEQ_LEN].set(eot_onehot)

    kern = functools.partial(
        fused_kernel, m_views=M, batch=B, n_prompt=N_PROMPT, n_cls=N_CLS,
        seq_len=SEQ_LEN, ctx_dim=CTX_DIM, u=1.0 / M, v=1.0 / N_PROMPT,
        eps=SINK_EPS, max_iter=SINK_MAX_ITER, thresh=SINK_THRESH,
        check_every=SINK_CHECK_EVERY, out_rows=OUT_ROWS, out_cols=OUT_COLS)

    # NOTE: `logits = logit_scale * image_feature_pool @ text_feature_pool.t()` in the
    # reference is dead code (never returned), so it is not computed here.
    # TODO(synk): if M/B grow, add a grid axis + dimension_semantics=("parallel",) so
    # v7x's second TensorCore is used; a single invocation is pinned to one core.
    out_pad = pl.pallas_call(
        kern,
        out_shape=jax.ShapeDtypeStruct((OUT_ROWS, OUT_COLS), jnp.float32),
        in_specs=[_smem()] + [_vmem()] * 5,
        out_specs=_vmem(),
    )(scale, x, params["w_img"], prompts, params["text_proj"], pack)
    return out_pad[:B, :N_CLS]


if __name__ == "__main__":
    key = jax.random.PRNGKey(0)
    ks = jax.random.split(key, 8)
    params = {
        "w_img": 0.02 * jax.random.normal(ks[0], (IMG_C * IMG_H * IMG_W, D_FEAT), jnp.float32),
        "b_img": jnp.zeros((1, D_FEAT), jnp.float32),
        "ctx": 0.02 * jax.random.normal(ks[1], (N_PROMPT, N_CTX, CTX_DIM), jnp.float32),
        "token_prefix": 0.02 * jax.random.normal(
            ks[2], (N_PROMPT * N_CLS, 1, CTX_DIM), jnp.float32),
        "token_suffix": 0.02 * jax.random.normal(
            ks[3], (N_PROMPT * N_CLS, SEQ_LEN - 1 - N_CTX, CTX_DIM), jnp.float32),
        "pos_emb": 0.01 * jax.random.normal(ks[4], (SEQ_LEN, CTX_DIM), jnp.float32),
        "ln_w": jnp.ones((1, CTX_DIM), jnp.float32),
        "ln_b": jnp.zeros((1, CTX_DIM), jnp.float32),
        "text_proj": 0.05 * jax.random.normal(ks[5], (CTX_DIM, D_FEAT), jnp.float32),
        "logit_scale": jnp.array(np.log(1.0 / 0.07), jnp.float32),
    }

    # Deterministic synthetic tokenized prompts (EOT = max token id defines argmax pos).
    # TODO(synk): clip.tokenize / _Tokenizer are external; synthetic ids stand in.
    tok = np.ones((N_CLS, SEQ_LEN), np.int32)
    for i in range(N_CLS):
        name_len = 1 + (i % 3)
        tok[i, 1 + N_CTX + name_len] = 49407
    tok = np.tile(tok, (N_PROMPT, 1))                               # .repeat(N, 1)
    params["tokenized_prompts"] = jnp.asarray(tok)

    image = jax.random.normal(ks[6], (M_VIEWS, BATCH, IMG_C, IMG_H, IMG_W), jnp.float32)

    logits2 = custom_clip_forward(image, params)
    logits2 = jax.block_until_ready(logits2)
    assert logits2.shape == (BATCH, N_CLS)
    assert bool(jnp.all(jnp.isfinite(logits2)))
    print("KERNEL_OK")
</pallas_src>

<mosaic_0001>
module attributes {stable_mosaic.version = 11 : i64} {
  func.func @fused_kernel(%arg0: memref<1x1xf32, #tpu.memory_space<smem>>, %arg1: memref<8x768xf32, #tpu.memory_space<vmem>>, %arg2: memref<768x64xf32, #tpu.memory_space<vmem>>, %arg3: memref<10x16x32xf32, #tpu.memory_space<vmem>>, %arg4: memref<32x64xf32, #tpu.memory_space<vmem>>, %arg5: memref<32x64xf32, #tpu.memory_space<vmem>>, %arg6: memref<8x128xf32, #tpu.memory_space<vmem>>) attributes {dimension_semantics = [], scalar_prefetch = 0 : i64, scratch_operands = 0 : i64, tpu.core_type = #tpu.core_type<tc>} {
    %c0 = arith.constant 0 : index
    %c0_0 = arith.constant 0 : index
    %0 = vector.load %arg5[%c0, %c0_0] : memref<32x64xf32, #tpu.memory_space<vmem>>, vector<32x64xf32>
    %1 = vector.extract_strided_slice %0 {offsets = [0, 0], sizes = [1, 64], strides = [1, 1]} : vector<32x64xf32> to vector<1x64xf32>
    %2 = vector.extract_strided_slice %0 {offsets = [1, 0], sizes = [16, 32], strides = [1, 1]} : vector<32x64xf32> to vector<16x32xf32>
    %3 = vector.extract_strided_slice %0 {offsets = [17, 0], sizes = [1, 32], strides = [1, 1]} : vector<32x64xf32> to vector<1x32xf32>
    %4 = vector.extract_strided_slice %0 {offsets = [18, 0], sizes = [1, 32], strides = [1, 1]} : vector<32x64xf32> to vector<1x32xf32>
    %5 = vector.extract_strided_slice %0 {offsets = [19, 0], sizes = [10, 16], strides = [1, 1]} : vector<32x64xf32> to vector<10x16xf32>
    %c0_1 = arith.constant 0 : index
    %c0_2 = arith.constant 0 : index
    %6 = vector.load %arg1[%c0_1, %c0_2] : memref<8x768xf32, #tpu.memory_space<vmem>>, vector<8x768xf32>
    %c0_3 = arith.constant 0 : index
    %c0_4 = arith.constant 0 : index
    %7 = vector.load %arg2[%c0_3, %c0_4] : memref<768x64xf32, #tpu.memory_space<vmem>>, vector<768x64xf32>
    %cst = arith.constant dense<0.000000e+00> : vector<8x64xf32>
    %8 = tpu.matmul %6, %7, %cst {dimension_numbers = #tpu.dot_dimension_numbers<[1], [0], [0], [1], [0, 0, 1, 1], [], []>} : vector<8x768xf32>, vector<768x64xf32>, vector<8x64xf32> -> vector<8x64xf32>
    %9 = vector.broadcast %1 : vector<1x64xf32> to vector<8x64xf32>
    %10 = arith.addf %8, %9 : vector<8x64xf32>
    %c0_5 = arith.constant 0 : index
    %c0_6 = arith.constant 0 : index
    %c0_7 = arith.constant 0 : index
    %11 = vector.load %arg3[%c0_5, %c0_6, %c0_7] : memref<10x16x32xf32, #tpu.memory_space<vmem>>, vector<10x16x32xf32>
    %12 = vector.shape_cast %5 : vector<10x16xf32> to vector<10x16x1xf32>
    %13 = vector.broadcast %12 : vector<10x16x1xf32> to vector<10x16x32xf32>
    %14 = arith.mulf %11, %13 : vector<10x16x32xf32>
    %cst_8 = arith.constant dense<0.000000e+00> : vector<10x32xf32>
    %15 = vector.multi_reduction <add>, %14, %cst_8 [1] : vector<10x16x32xf32> to vector<10x32xf32>
    %cst_9 = arith.constant dense<0.000000e+00> : vector<10x32xf32>
    %16 = tpu.matmul %5, %2, %cst_9 {dimension_numbers = #tpu.dot_dimension_numbers<[1], [0], [0], [1], [0, 0, 1, 1], [], []>} : vector<10x16xf32>, vector<16x32xf32>, vector<10x32xf32> -> vector<10x32xf32>
    %17 = arith.addf %15, %16 : vector<10x32xf32>
    %cst_10 = arith.constant dense<0.000000e+00> : vector<10xf32>
    %18 = vector.multi_reduction <add>, %17, %cst_10 [1] : vector<10x32xf32> to vector<10xf32>
    %19 = vector.shape_cast %18 : vector<10xf32> to vector<10x1xf32>
    %cst_11 = arith.constant 3.200000e+01 : f32
    %20 = vector.broadcast %cst_11 : f32 to vector<10x1xf32>
    %21 = arith.divf %19, %20 : vector<10x1xf32>
    %22 = vector.broadcast %21 : vector<10x1xf32> to vector<10x32xf32>
    %23 = arith.subf %17, %22 : vector<10x32xf32>
    %24 = arith.mulf %23, %23 : vector<10x32xf32>
    %cst_12 = arith.constant dense<0.000000e+00> : vector<10xf32>
    %25 = vector.multi_reduction <add>, %24, %cst_12 [1] : vector<10x32xf32> to vector<10xf32>
    %26 = vector.shape_cast %25 : vector<10xf32> to vector<10x1xf32>
    %cst_13 = arith.constant 3.200000e+01 : f32
    %27 = vector.broadcast %cst_13 : f32 to vector<10x1xf32>
    %28 = arith.divf %26, %27 : vector<10x1xf32>
    %cst_14 = arith.constant 9.99999974E-6 : f32
    %29 = vector.broadcast %cst_14 : f32 to vector<10x1xf32>
    %30 = arith.addf %28, %29 : vector<10x1xf32>
    %31 = math.rsqrt %30 : vector<10x1xf32>
    %32 = vector.broadcast %31 : vector<10x1xf32> to vector<10x32xf32>
    %33 = arith.mulf %23, %32 : vector<10x32xf32>
    %34 = vector.broadcast %3 : vector<1x32xf32> to vector<10x32xf32>
    %35 = arith.mulf %33, %34 : vector<10x32xf32>
    %36 = vector.broadcast %4 : vector<1x32xf32> to vector<10x32xf32>
    %37 = arith.addf %35, %36 : vector<10x32xf32>
    %c0_15 = arith.constant 0 : index
    %c0_16 = arith.constant 0 : index
    %38 = vector.load %arg4[%c0_15, %c0_16] : memref<32x64xf32, #tpu.memory_space<vmem>>, vector<32x64xf32>
    %cst_17 = arith.constant dense<0.000000e+00> : vector<10x64xf32>
    %39 = tpu.matmul %37, %38, %cst_17 {dimension_numbers = #tpu.dot_dimension_numbers<[1], [0], [0], [1], [0, 0, 1, 1], [], []>} : vector<10x32xf32>, vector<32x64xf32>, vector<10x64xf32> -> vector<10x64xf32>
    %40 = arith.mulf %10, %10 : vector<8x64xf32>
    %cst_18 = arith.constant dense<0.000000e+00> : vector<8xf32>
    %41 = vector.multi_reduction <add>, %40, %cst_18 [1] : vector<8x64xf32> to vector<8xf32>
    %42 = vector.shape_cast %41 : vector<8xf32> to vector<8x1xf32>
    %cst_19 = arith.constant 1.000000e-24 : f32
    %43 = vector.broadcast %cst_19 : f32 to vector<8x1xf32>
    %44 = arith.maximumf %42, %43 : vector<8x1xf32>
    %45 = math.rsqrt %44 : vector<8x1xf32>
    %46 = vector.broadcast %45 : vector<8x1xf32> to vector<8x64xf32>
    %47 = arith.mulf %10, %46 : vector<8x64xf32>
    %48 = arith.mulf %39, %39 : vector<10x64xf32>
    %cst_20 = arith.constant dense<0.000000e+00> : vector<10xf32>
    %49 = vector.multi_reduction <add>, %48, %cst_20 [1] : vector<10x64xf32> to vector<10xf32>
    %50 = vector.shape_cast %49 : vector<10xf32> to vector<10x1xf32>
    %cst_21 = arith.constant 1.000000e-24 : f32
    %51 = vector.broadcast %cst_21 : f32 to vector<10x1xf32>
    %52 = arith.maximumf %50, %51 : vector<10x1xf32>
    %53 = math.rsqrt %52 : vector<10x1xf32>
    %54 = vector.broadcast %53 : vector<10x1xf32> to vector<10x64xf32>
    %55 = arith.mulf %39, %54 : vector<10x64xf32>
    %cst_22 = arith.constant dense<0.000000e+00> : vector<8x10xf32>
    %56 = tpu.matmul %47, %55, %cst_22 {dimension_numbers = #tpu.dot_dimension_numbers<[1], [1], [0], [0], [0, 0, 1, 0], [], []>} : vector<8x64xf32>, vector<10x64xf32>, vector<8x10xf32> -> vector<8x10xf32>
    %cst_23 = arith.constant 1.000000e+00 : f32
    %57 = vector.broadcast %cst_23 : f32 to vector<8x10xf32>
    %58 = arith.subf %56, %57 : vector<8x10xf32>
    %cst_24 = arith.constant 1.000000e+01 : f32
    %59 = vector.broadcast %cst_24 : f32 to vector<8x10xf32>
    %60 = arith.mulf %58, %59 : vector<8x10xf32>
    %61 = math.exp %60 : vector<8x10xf32>
    %cst_25 = arith.constant 1.000000e+00 : f32
    %62 = vector.broadcast %cst_25 : f32 to vector<8x5xf32>
    %cst_26 = arith.constant 1.000000e+00 : f32
    %63 = vector.broadcast %cst_26 : f32 to vector<2x10xf32>
    %c0_i32 = arith.constant 0 : i32
    %cst_27 = arith.constant 1.000000e+30 : f32
    %64:4 = scf.while (%arg7 = %c0_i32, %arg8 = %cst_27, %arg9 = %62, %arg10 = %63) : (i32, f32, vector<8x5xf32>, vector<2x10xf32>) -> (i32, f32, vector<8x5xf32>, vector<2x10xf32>) {
      %c100_i32 = arith.constant 100 : i32
      %126 = arith.cmpi slt, %arg7, %c100_i32 : i32
      %cst_38 = arith.constant 0.00999999977 : f32
      %127 = arith.cmpf oge, %arg8, %cst_38 : f32
      %128 = arith.andi %126, %127 : i1
      scf.condition(%128) %arg7, %arg8, %arg9, %arg10 : i32, f32, vector<8x5xf32>, vector<2x10xf32>
    } do {
    ^bb0(%arg7: i32, %arg8: f32, %arg9: vector<8x5xf32>, %arg10: vector<2x10xf32>):
      %126 = tpu.concatenate %arg10, %arg10, %arg10, %arg10 in 0 : vector<2x10xf32>, vector<2x10xf32>, vector<2x10xf32>, vector<2x10xf32> -> vector<8x10xf32>
      %127 = arith.mulf %61, %126 : vector<8x10xf32>
      %128 = vector.extract_strided_slice %127 {offsets = [0, 0], sizes = [8, 5], strides = [1, 1]} : vector<8x10xf32> to vector<8x5xf32>
      %129 = vector.extract_strided_slice %127 {offsets = [0, 5], sizes = [8, 5], strides = [1, 1]} : vector<8x10xf32> to vector<8x5xf32>
      %130 = arith.addf %128, %129 : vector<8x5xf32>
      %131 = tpu.reciprocal %130 {approx = true} : vector<8x5xf32> -> vector<8x5xf32>
      %cst_38 = arith.constant 2.500000e-01 : f32
      %132 = vector.broadcast %cst_38 : f32 to vector<8x5xf32>
      %133 = arith.mulf %132, %131 : vector<8x5xf32>
      %134 = tpu.concatenate %133, %133 in 1 : vector<8x5xf32>, vector<8x5xf32> -> vector<8x10xf32>
      %135 = arith.mulf %61, %134 : vector<8x10xf32>
      %136 = vector.extract_strided_slice %135 {offsets = [0, 0], sizes = [2, 10], strides = [1, 1]} : vector<8x10xf32> to vector<2x10xf32>
      %137 = vector.extract_strided_slice %135 {offsets = [2, 0], sizes = [2, 10], strides = [1, 1]} : vector<8x10xf32> to vector<2x10xf32>
      %138 = arith.addf %136, %137 : vector<2x10xf32>
      %139 = vector.extract_strided_slice %135 {offsets = [4, 0], sizes = [2, 10], strides = [1, 1]} : vector<8x10xf32> to vector<2x10xf32>
      %140 = arith.addf %138, %139 : vector<2x10xf32>
      %141 = vector.extract_strided_slice %135 {offsets = [6, 0], sizes = [2, 10], strides = [1, 1]} : vector<8x10xf32> to vector<2x10xf32>
      %142 = arith.addf %140, %141 : vector<2x10xf32>
      %143 = tpu.reciprocal %142 {approx = true} : vector<2x10xf32> -> vector<2x10xf32>
      %cst_39 = arith.constant 5.000000e-01 : f32
      %144 = vector.broadcast %cst_39 : f32 to vector<2x10xf32>
      %145 = arith.mulf %144, %143 : vector<2x10xf32>
      %146 = tpu.concatenate %145, %145, %145, %145 in 0 : vector<2x10xf32>, vector<2x10xf32>, vector<2x10xf32>, vector<2x10xf32> -> vector<8x10xf32>
      %147 = arith.mulf %61, %146 : vector<8x10xf32>
      %148 = vector.extract_strided_slice %147 {offsets = [0, 0], sizes = [8, 5], strides = [1, 1]} : vector<8x10xf32> to vector<8x5xf32>
      %149 = vector.extract_strided_slice %147 {offsets = [0, 5], sizes = [8, 5], strides = [1, 1]} : vector<8x10xf32> to vector<8x5xf32>
      %150 = arith.addf %148, %149 : vector<8x5xf32>
      %151 = tpu.reciprocal %150 {approx = true} : vector<8x5xf32> -> vector<8x5xf32>
      %cst_40 = arith.constant 2.500000e-01 : f32
      %152 = vector.broadcast %cst_40 : f32 to vector<8x5xf32>
      %153 = arith.mulf %152, %151 : vector<8x5xf32>
      %154 = tpu.concatenate %153, %153 in 1 : vector<8x5xf32>, vector<8x5xf32> -> vector<8x10xf32>
      %155 = arith.mulf %61, %154 : vector<8x10xf32>
      %156 = vector.extract_strided_slice %155 {offsets = [0, 0], sizes = [2, 10], strides = [1, 1]} : vector<8x10xf32> to vector<2x10xf32>
      %157 = vector.extract_strided_slice %155 {offsets = [2, 0], sizes = [2, 10], strides = [1, 1]} : vector<8x10xf32> to vector<2x10xf32>
      %158 = arith.addf %156, %157 : vector<2x10xf32>
      %159 = vector.extract_strided_slice %155 {offsets = [4, 0], sizes = [2, 10], strides = [1, 1]} : vector<8x10xf32> to vector<2x10xf32>
      %160 = arith.addf %158, %159 : vector<2x10xf32>
      %161 = vector.extract_strided_slice %155 {offsets = [6, 0], sizes = [2, 10], strides = [1, 1]} : vector<8x10xf32> to vector<2x10xf32>
      %162 = arith.addf %160, %161 : vector<2x10xf32>
      %163 = tpu.reciprocal %162 {approx = true} : vector<2x10xf32> -> vector<2x10xf32>
      %cst_41 = arith.constant 5.000000e-01 : f32
      %164 = vector.broadcast %cst_41 : f32 to vector<2x10xf32>
      %165 = arith.mulf %164, %163 : vector<2x10xf32>
      %166 = tpu.concatenate %165, %165, %165, %165 in 0 : vector<2x10xf32>, vector<2x10xf32>, vector<2x10xf32>, vector<2x10xf32> -> vector<8x10xf32>
      %167 = arith.mulf %61, %166 : vector<8x10xf32>
      %168 = vector.extract_strided_slice %167 {offsets = [0, 0], sizes = [8, 5], strides = [1, 1]} : vector<8x10xf32> to vector<8x5xf32>
      %169 = vector.extract_strided_slice %167 {offsets = [0, 5], sizes = [8, 5], strides = [1, 1]} : vector<8x10xf32> to vector<8x5xf32>
      %170 = arith.addf %168, %169 : vector<8x5xf32>
      %171 = tpu.reciprocal %170 {approx = true} : vector<8x5xf32> -> vector<8x5xf32>
      %cst_42 = arith.constant 2.500000e-01 : f32
      %172 = vector.broadcast %cst_42 : f32 to vector<8x5xf32>
      %173 = arith.mulf %172, %171 : vector<8x5xf32>
      %174 = tpu.concatenate %173, %173 in 1 : vector<8x5xf32>, vector<8x5xf32> -> vector<8x10xf32>
      %175 = arith.mulf %61, %174 : vector<8x10xf32>
      %176 = vector.extract_strided_slice %175 {offsets = [0, 0], sizes = [2, 10], strides = [1, 1]} : vector<8x10xf32> to vector<2x10xf32>
      %177 = vector.extract_strided_slice %175 {offsets = [2, 0], sizes = [2, 10], strides = [1, 1]} : vector<8x10xf32> to vector<2x10xf32>
      %178 = arith.addf %176, %177 : vector<2x10xf32>
      %179 = vector.extract_strided_slice %175 {offsets = [4, 0], sizes = [2, 10], strides = [1, 1]} : vector<8x10xf32> to vector<2x10xf32>
      %180 = arith.addf %178, %179 : vector<2x10xf32>
      %181 = vector.extract_strided_slice %175 {offsets = [6, 0], sizes = [2, 10], strides = [1, 1]} : vector<8x10xf32> to vector<2x10xf32>
      %182 = arith.addf %180, %181 : vector<2x10xf32>
      %183 = tpu.reciprocal %182 {approx = true} : vector<2x10xf32> -> vector<2x10xf32>
      %cst_43 = arith.constant 5.000000e-01 : f32
      %184 = vector.broadcast %cst_43 : f32 to vector<2x10xf32>
      %185 = arith.mulf %184, %183 : vector<2x10xf32>
      %186 = tpu.concatenate %185, %185, %185, %185 in 0 : vector<2x10xf32>, vector<2x10xf32>, vector<2x10xf32>, vector<2x10xf32> -> vector<8x10xf32>
      %187 = arith.mulf %61, %186 : vector<8x10xf32>
      %188 = vector.extract_strided_slice %187 {offsets = [0, 0], sizes = [8, 5], strides = [1, 1]} : vector<8x10xf32> to vector<8x5xf32>
      %189 = vector.extract_strided_slice %187 {offsets = [0, 5], sizes = [8, 5], strides = [1, 1]} : vector<8x10xf32> to vector<8x5xf32>
      %190 = arith.addf %188, %189 : vector<8x5xf32>
      %191 = tpu.reciprocal %190 {approx = true} : vector<8x5xf32> -> vector<8x5xf32>
      %cst_44 = arith.constant 2.500000e-01 : f32
      %192 = vector.broadcast %cst_44 : f32 to vector<8x5xf32>
      %193 = arith.mulf %192, %191 : vector<8x5xf32>
      %194 = tpu.concatenate %193, %193 in 1 : vector<8x5xf32>, vector<8x5xf32> -> vector<8x10xf32>
      %195 = arith.mulf %61, %194 : vector<8x10xf32>
      %196 = vector.extract_strided_slice %195 {offsets = [0, 0], sizes = [2, 10], strides = [1, 1]} : vector<8x10xf32> to vector<2x10xf32>
      %197 = vector.extract_strided_slice %195 {offsets = [2, 0], sizes = [2, 10], strides = [1, 1]} : vector<8x10xf32> to vector<2x10xf32>
      %198 = arith.addf %196, %197 : vector<2x10xf32>
      %199 = vector.extract_strided_slice %195 {offsets = [4, 0], sizes = [2, 10], strides = [1, 1]} : vector<8x10xf32> to vector<2x10xf32>
      %200 = arith.addf %198, %199 : vector<2x10xf32>
      %201 = vector.extract_strided_slice %195 {offsets = [6, 0], sizes = [2, 10], strides = [1, 1]} : vector<8x10xf32> to vector<2x10xf32>
      %202 = arith.addf %200, %201 : vector<2x10xf32>
      %203 = tpu.reciprocal %202 {approx = true} : vector<2x10xf32> -> vector<2x10xf32>
      %cst_45 = arith.constant 5.000000e-01 : f32
      %204 = vector.broadcast %cst_45 : f32 to vector<2x10xf32>
      %205 = arith.mulf %204, %203 : vector<2x10xf32>
      %206 = tpu.concatenate %205, %205, %205, %205 in 0 : vector<2x10xf32>, vector<2x10xf32>, vector<2x10xf32>, vector<2x10xf32> -> vector<8x10xf32>
      %207 = arith.mulf %61, %206 : vector<8x10xf32>
      %208 = vector.extract_strided_slice %207 {offsets = [0, 0], sizes = [8, 5], strides = [1, 1]} : vector<8x10xf32> to vector<8x5xf32>
      %209 = vector.extract_strided_slice %207 {offsets = [0, 5], sizes = [8, 5], strides = [1, 1]} : vector<8x10xf32> to vector<8x5xf32>
      %210 = arith.addf %208, %209 : vector<8x5xf32>
      %211 = tpu.reciprocal %210 {approx = true} : vector<8x5xf32> -> vector<8x5xf32>
      %cst_46 = arith.constant 2.500000e-01 : f32
      %212 = vector.broadcast %cst_46 : f32 to vector<8x5xf32>
      %213 = arith.mulf %212, %211 : vector<8x5xf32>
      %214 = tpu.concatenate %213, %213 in 1 : vector<8x5xf32>, vector<8x5xf32> -> vector<8x10xf32>
      %215 = arith.mulf %61, %214 : vector<8x10xf32>
      %216 = vector.extract_strided_slice %215 {offsets = [0, 0], sizes = [2, 10], strides = [1, 1]} : vector<8x10xf32> to vector<2x10xf32>
      %217 = vector.extract_strided_slice %215 {offsets = [2, 0], sizes = [2, 10], strides = [1, 1]} : vector<8x10xf32> to vector<2x10xf32>
      %218 = arith.addf %216, %217 : vector<2x10xf32>
      %219 = vector.extract_strided_slice %215 {offsets = [4, 0], sizes = [2, 10], strides = [1, 1]} : vector<8x10xf32> to vector<2x10xf32>
      %220 = arith.addf %218, %219 : vector<2x10xf32>
      %221 = vector.extract_strided_slice %215 {offsets = [6, 0], sizes = [2, 10], strides = [1, 1]} : vector<8x10xf32> to vector<2x10xf32>
      %222 = arith.addf %220, %221 : vector<2x10xf32>
      %223 = tpu.reciprocal %222 {approx = true} : vector<2x10xf32> -> vector<2x10xf32>
      %cst_47 = arith.constant 5.000000e-01 : f32
      %224 = vector.broadcast %cst_47 : f32 to vector<2x10xf32>
      %225 = arith.mulf %224, %223 : vector<2x10xf32>
      %226 = arith.subf %213, %193 : vector<8x5xf32>
      %227 = math.absf %226 : vector<8x5xf32>
      %228 = vector.shape_cast %227 : vector<8x5xf32> to vector<1x8x5xf32>
      %cst_48 = arith.constant dense<0.000000e+00> : vector<1xf32>
      %229 = vector.multi_reduction <add>, %228, %cst_48 [1, 2] : vector<1x8x5xf32> to vector<1xf32>
      %230 = vector.shape_cast %229 : vector<1xf32> to vector<1x1x1xf32>
      %231 = vector.extract %230[0, 0, 0] : f32 from vector<1x1x1xf32>
      %cst_49 = arith.constant 4.000000e+01 : f32
      %232 = arith.divf %231, %cst_49 : f32
      %c5_i32_50 = arith.constant 5 : i32
      %233 = arith.addi %arg7, %c5_i32_50 : i32
      scf.yield %233, %232, %213, %225 : i32, f32, vector<8x5xf32>, vector<2x10xf32>
    }
    %65 = tpu.concatenate %64#3, %64#3, %64#3, %64#3 in 0 : vector<2x10xf32>, vector<2x10xf32>, vector<2x10xf32>, vector<2x10xf32> -> vector<8x10xf32>
    %66 = arith.mulf %61, %65 : vector<8x10xf32>
    %67 = vector.extract_strided_slice %66 {offsets = [0, 0], sizes = [8, 5], strides = [1, 1]} : vector<8x10xf32> to vector<8x5xf32>
    %68 = vector.extract_strided_slice %66 {offsets = [0, 5], sizes = [8, 5], strides = [1, 1]} : vector<8x10xf32> to vector<8x5xf32>
    %69 = arith.addf %67, %68 : vector<8x5xf32>
    %cst_28 = arith.constant 2.500000e-01 : f32
    %70 = vector.broadcast %cst_28 : f32 to vector<8x5xf32>
    %71 = arith.divf %70, %69 : vector<8x5xf32>
    %72 = tpu.concatenate %71, %71 in 1 : vector<8x5xf32>, vector<8x5xf32> -> vector<8x10xf32>
    %73 = arith.mulf %61, %72 : vector<8x10xf32>
    %74 = vector.extract_strided_slice %73 {offsets = [0, 0], sizes = [2, 10], strides = [1, 1]} : vector<8x10xf32> to vector<2x10xf32>
    %75 = vector.extract_strided_slice %73 {offsets = [2, 0], sizes = [2, 10], strides = [1, 1]} : vector<8x10xf32> to vector<2x10xf32>
    %76 = arith.addf %74, %75 : vector<2x10xf32>
    %77 = vector.extract_strided_slice %73 {offsets = [4, 0], sizes = [2, 10], strides = [1, 1]} : vector<8x10xf32> to vector<2x10xf32>
    %78 = arith.addf %76, %77 : vector<2x10xf32>
    %79 = vector.extract_strided_slice %73 {offsets = [6, 0], sizes = [2, 10], strides = [1, 1]} : vector<8x10xf32> to vector<2x10xf32>
    %80 = arith.addf %78, %79 : vector<2x10xf32>
    %cst_29 = arith.constant 5.000000e-01 : f32
    %81 = vector.broadcast %cst_29 : f32 to vector<2x10xf32>
    %82 = arith.divf %81, %80 : vector<2x10xf32>
    %83 = tpu.concatenate %71, %71 in 1 : vector<8x5xf32>, vector<8x5xf32> -> vector<8x10xf32>
    %84 = tpu.concatenate %82, %82, %82, %82 in 0 : vector<2x10xf32>, vector<2x10xf32>, vector<2x10xf32>, vector<2x10xf32> -> vector<8x10xf32>
    %85 = arith.mulf %83, %84 : vector<8x10xf32>
    %86 = arith.mulf %85, %61 : vector<8x10xf32>
    %87 = arith.mulf %86, %56 : vector<8x10xf32>
    %88 = tpu.iota {dimensions = array<i32: 0>} : vector<8x8xi32>
    %89 = tpu.iota {dimensions = array<i32: 1>} : vector<8x8xi32>
    %90 = arith.cmpi eq, %89, %88 : vector<8x8xi32>
    %c2_i32 = arith.constant 2 : i32
    %91 = vector.broadcast %c2_i32 : i32 to vector<8x8xi32>
    %92 = arith.addi %91, %88 : vector<8x8xi32>
    %93 = arith.cmpi eq, %89, %92 : vector<8x8xi32>
    %94 = arith.ori %90, %93 : vector<8x8xi1>
    %c4_i32 = arith.constant 4 : i32
    %95 = vector.broadcast %c4_i32 : i32 to vector<8x8xi32>
    %96 = arith.addi %95, %88 : vector<8x8xi32>
    %97 = arith.cmpi eq, %89, %96 : vector<8x8xi32>
    %98 = arith.ori %94, %97 : vector<8x8xi1>
    %c6_i32 = arith.constant 6 : i32
    %99 = vector.broadcast %c6_i32 : i32 to vector<8x8xi32>
    %100 = arith.addi %99, %88 : vector<8x8xi32>
    %101 = arith.cmpi eq, %89, %100 : vector<8x8xi32>
    %102 = arith.ori %98, %101 : vector<8x8xi1>
    %c2_i32_30 = arith.constant 2 : i32
    %103 = vector.broadcast %c2_i32_30 : i32 to vector<8x8xi32>
    %104 = arith.cmpi slt, %88, %103 : vector<8x8xi32>
    %105 = arith.andi %102, %104 : vector<8x8xi1>
    %106 = arith.extui %105 : vector<8x8xi1> to vector<8x8xi32>
    %107 = arith.sitofp %106 : vector<8x8xi32> to vector<8x8xf32>
    %108 = tpu.iota {dimensions = array<i32: 0>} : vector<10x128xi32>
    %109 = tpu.iota {dimensions = array<i32: 1>} : vector<10x128xi32>
    %110 = arith.cmpi eq, %108, %109 : vector<10x128xi32>
    %c5_i32 = arith.constant 5 : i32
    %111 = vector.broadcast %c5_i32 : i32 to vector<10x128xi32>
    %112 = arith.addi %111, %109 : vector<10x128xi32>
    %113 = arith.cmpi eq, %108, %112 : vector<10x128xi32>
    %114 = arith.ori %110, %113 : vector<10x128xi1>
    %c5_i32_31 = arith.constant 5 : i32
    %115 = vector.broadcast %c5_i32_31 : i32 to vector<10x128xi32>
    %116 = arith.cmpi slt, %109, %115 : vector<10x128xi32>
    %117 = arith.andi %114, %116 : vector<10x128xi1>
    %118 = arith.extui %117 : vector<10x128xi1> to vector<10x128xi32>
    %119 = arith.sitofp %118 : vector<10x128xi32> to vector<10x128xf32>
    %cst_32 = arith.constant dense<0.000000e+00> : vector<8x10xf32>
    %120 = tpu.matmul %107, %87, %cst_32 {dimension_numbers = #tpu.dot_dimension_numbers<[1], [0], [0], [1], [0, 0, 1, 1], [], []>} : vector<8x8xf32>, vector<8x10xf32>, vector<8x10xf32> -> vector<8x10xf32>
    %cst_33 = arith.constant dense<0.000000e+00> : vector<8x128xf32>
    %121 = tpu.matmul %120, %119, %cst_33 {dimension_numbers = #tpu.dot_dimension_numbers<[1], [0], [0], [1], [0, 0, 1, 1], [], []>} : vector<8x10xf32>, vector<10x128xf32>, vector<8x128xf32> -> vector<8x128xf32>
    %c0_34 = arith.constant 0 : index
    %c0_35 = arith.constant 0 : index
    %122 = memref.load %arg0[%c0_34, %c0_35] : memref<1x1xf32, #tpu.memory_space<smem>>
    %123 = vector.broadcast %122 : f32 to vector<8x128xf32>
    %124 = arith.mulf %123, %121 : vector<8x128xf32>
    %c0_36 = arith.constant 0 : index
    %c0_37 = arith.constant 0 : index
    %125 = vector.load %arg6[%c0_36, %c0_37] : memref<8x128xf32, #tpu.memory_space<vmem>>, vector<8x128xf32>
    tpu.vector_store %arg6[%c0_36, %c0_37], %124 {strides = array<i32>} : memref<8x128xf32, #tpu.memory_space<vmem>>, vector<8x128xf32>,
    return
  }
}

</mosaic_0001>

<bundles_post_ra>
// kernel: custom_clip_forward.1
= control target key start
LH: loop header
LB: loop body
LE: loop exit
PB: predicated region body
PF: predicated region fallthrough
CT: control target
= control target key end

     0   :  { %v130_v56 = vlaneseq  ;;  %vm593_vm0 = vcmask 1046528   ;;  %vm587_vm1 = vcmask 1044480   ;;  %vm601_vm2 = vcmask 130048   ;;  %s2674_s0 = inlined_call_operand.<no memory space> [shape: f32[1,1], index: 0, kind: input, shape index: {}]   ;;  %s2675_s2 = inlined_call_operand.vmem [shape: f32[768,64], index: 2, kind: input, shape index: {}]   ;;  %s2676_s6 = inlined_call_operand.vmem [shape: f32[8,128], index: 6, kind: output, shape index: {}]   ;;  %s2677_s1 = inlined_call_operand.vmem [shape: f32[8,768], index: 1, kind: input, shape index: {}]   ;;  %s2678_s5 = inlined_call_operand.vmem [shape: f32[32,64], index: 5, kind: input, shape index: {}]   ;;  %s2679_s3 = inlined_call_operand.vmem [shape: f32[10,16,32], index: 3, kind: input, shape index: {}]   ;;  %s2680_s4 = inlined_call_operand.vmem [shape: f32[32,64], index: 4, kind: input, shape index: {}]  }
   0x1   :  { %11 = sst [smem:[#allocation2]] %s2674_s0  ;;  %v50_v0 = vld [vmem:[%s2675_s2 + $0x80] sm:$0xff]  ;;  %v51_v1 = vld [vmem:[%s2675_s2 + $0x88] sm:$0xff]  ;;  %v52_v11 = vld [vmem:[%s2675_s2 + $0x90] sm:$0xff]  ;;  %vm494_vm3 = vcmask 261120   ;;  %vm722_vm4 = vcmask 1041409  }
   0x2   :  { %v82_v2 = vld [vmem:[%s2675_s2 + $0x180] sm:$0xff]  ;;  %v1750_v3 = vpack.c.bf16 %v51_v1, %v50_v0  ;;  %v83_v4 = vld [vmem:[%s2675_s2 + $0x188] sm:$0xff]  ;;  %v53_v13 = vld [vmem:[%s2675_s2 + $0x98] sm:$0xff]  ;;  %vm749_vm5 = vcmask 254976   ;;  %vm725_vm6 = vcmask 1042434   ;;  %vm728_vm7 = vcmask 1043459  }
   0x3   :  { %v34_v5 = vld [vmem:[%s2675_s2] sm:$0xff]  ;;  %v35_v6 = vld [vmem:[%s2675_s2 + $0x8] sm:$0xff]  ;;  %v1782_v7 = vpack.c.bf16 %v83_v4, %v82_v2  ;;  %v84_v14 = vld [vmem:[%s2675_s2 + $0x190] sm:$0xff]  ;;  %v1754_v16 = vpack.c.bf16 %v53_v13, %v52_v11  ;;  %vm731_vm8 = vcmask 1044484   ;;  %vm734_vm9 = vcmask 1045509  }
   0x4   :  { %v1752_v8 = vpack.c.bf16 %v35_v6, %v34_v5  ;;  %v66_v9 = vld [vmem:[%s2675_s2 + $0x100] sm:$0xff]  ;;  %v67_v10 = vld [vmem:[%s2675_s2 + $0x108] sm:$0xff]  ;;  %1751 = vmatprep.subr.bf16.mxu0 %v1750_v3  ;;  %v85_v15 = vld [vmem:[%s2675_s2 + $0x198] sm:$0xff]  ;;  %v2132_v5 = vshrl.u32 %v130_v56, 7  ;;  %vm737_vm10 = vcmask 1046534   ;;  %vm740_vm11 = vcmask 1047559  }
   0x5   :  { %v1784_v12 = vpack.c.bf16 %v67_v10, %v66_v9  ;;  %1783 = vmatprep.subr.bf16.mxu1 %v1782_v7  ;;  %v1786_v17 = vpack.c.bf16 %v85_v15, %v84_v14  ;;  %v36_v18 = vld [vmem:[%s2675_s2 + $0x10] sm:$0xff]  ;;  %v37_v19 = vld [vmem:[%s2675_s2 + $0x18] sm:$0xff]  ;;  %v54_v23 = vld [vmem:[%s2675_s2 + $0xa0] sm:$0xff]  ;;  %vm1016_vm12 = vcmask 517120   ;;  %vm1004_vm13 = vcmask 523264  }
   0x6   :  { %1753 = vmatpush3.bf16.msra.mxu0 %v1752_v8  ;;  %v68_v20 = vld [vmem:[%s2675_s2 + $0x110] sm:$0xff]  ;;  %v1756_v21 = vpack.c.bf16 %v37_v19, %v36_v18  ;;  %v69_v22 = vld [vmem:[%s2675_s2 + $0x118] sm:$0xff]  ;;  %v55_v24 = vld [vmem:[%s2675_s2 + $0xa8] sm:$0xff]  ;;  %vm2681_vm14 = vmmov 0  }
   0x7   :  { %1785 = vmatpush3.bf16.msra.mxu1 %v1784_v12  ;;  %1755 = vmatprep.subr.bf16.mxu0 %v1754_v16  ;;  %v1788_v25 = vpack.c.bf16 %v69_v22, %v68_v20  ;;  %v1758_v26 = vpack.c.bf16 %v55_v24, %v54_v23  ;;  %v86_v27 = vld [vmem:[%s2675_s2 + $0x1a0] sm:$0xff]  ;;  %v87_v28 = vld [vmem:[%s2675_s2 + $0x1a8] sm:$0xff]  ;;  %v56_v35 = vld [vmem:[%s2675_s2 + $0xb0] sm:$0xff] }
   0x8   :  { %1787 = vmatprep.subr.bf16.mxu1 %v1786_v17  ;;  %v38_v29 = vld [vmem:[%s2675_s2 + $0x20] sm:$0xff]  ;;  %v1790_v30 = vpack.c.bf16 %v87_v28, %v86_v27  ;;  %v39_v31 = vld [vmem:[%s2675_s2 + $0x28] sm:$0xff]  ;;  %v57_v36 = vld [vmem:[%s2675_s2 + $0xb8] sm:$0xff] }
   0x9   :  { %v70_v32 = vld [vmem:[%s2675_s2 + $0x120] sm:$0xff]  ;;  %v71_v33 = vld [vmem:[%s2675_s2 + $0x128] sm:$0xff]  ;;  %v1760_v34 = vpack.c.bf16 %v39_v31, %v38_v29  ;;  %v88_v37 = vld [vmem:[%s2675_s2 + $0x1b0] sm:$0xff]  ;;  %v1762_v39 = vpack.c.bf16 %v57_v36, %v56_v35 }
   0xa   :  { %1757 = vmatpush3.bf16.msra.mxu0 %v1756_v21  ;;  %v1792_v38 = vpack.c.bf16 %v71_v33, %v70_v32  ;;  %v89_v40 = vld [vmem:[%s2675_s2 + $0x1b8] sm:$0xff]  ;;  %v40_v41 = vld [vmem:[%s2675_s2 + $0x30] sm:$0xff]  ;;  %v58_v46 = vld [vmem:[%s2675_s2 + $0xc0] sm:$0xff]  ;;  %v388_v21 = vsub.s32 5, %v2132_v5 }
   0xb   :  { %1789 = vmatpush3.bf16.msra.mxu1 %v1788_v25  ;;  %1759 = vmatprep.subr.bf16.mxu0 %v1758_v26  ;;  %v41_v42 = vld [vmem:[%s2675_s2 + $0x38] sm:$0xff]  ;;  %v1794_v43 = vpack.c.bf16 %v89_v40, %v88_v37  ;;  %v72_v44 = vld [vmem:[%s2675_s2 + $0x130] sm:$0xff]  ;;  %v59_v47 = vld [vmem:[%s2675_s2 + $0xc8] sm:$0xff]  ;;  %v377_v26 = vsub.s32 4, %v2132_v5 }
   0xc   :  { %1791 = vmatprep.subr.bf16.mxu1 %v1790_v30  ;;  %v73_v45 = vld [vmem:[%s2675_s2 + $0x138] sm:$0xff]  ;;  %v90_v48 = vld [vmem:[%s2675_s2 + $0x1c0] sm:$0xff]  ;;  %v91_v49 = vld [vmem:[%s2675_s2 + $0x1c8] sm:$0xff]  ;;  %v1764_v50 = vpack.c.bf16 %v41_v42, %v40_v41  ;;  %v1766_v52 = vpack.c.bf16 %v59_v47, %v58_v46 }
   0xd   :  { %v1796_v51 = vpack.c.bf16 %v73_v45, %v72_v44  ;;  %v42_v53 = vld [vmem:[%s2675_s2 + $0x40] sm:$0xff]  ;;  %v43_v54 = vld [vmem:[%s2675_s2 + $0x48] sm:$0xff]  ;;  %v1798_v57 = vpack.c.bf16 %v91_v49, %v90_v48  ;;  %v60_v59 = vld [vmem:[%s2675_s2 + $0xd0] sm:$0xff]  ;;  %v366_v49 = vsub.s32 3, %v2132_v5 }
   0xe   :  { %1761 = vmatpush3.bf16.msra.mxu0 %v1760_v34  ;;  %v74_v55 = vld [vmem:[%s2675_s2 + $0x140] sm:$0xff]  ;;  %v75_v58 = vld [vmem:[%s2675_s2 + $0x148] sm:$0xff]  ;;  %v61_v60 = vld [vmem:[%s2675_s2 + $0xd8] sm:$0xff]  ;;  %v1768_v63 = vpack.c.bf16 %v43_v54, %v42_v53 }
   0xf   :  { %1793 = vmatpush3.bf16.msra.mxu1 %v1792_v38  ;;  %1763 = vmatprep.subr.bf16.mxu0 %v1762_v39  ;;  %v92_v61 = vld [vmem:[%s2675_s2 + $0x1d0] sm:$0xff]  ;;  %v93_v62 = vld [vmem:[%s2675_s2 + $0x1d8] sm:$0xff]  ;;  %v1800_v0 = vpack.c.bf16 %v75_v58, %v74_v55  ;;  %v1770_v1 = vpack.c.bf16 %v61_v60, %v60_v59  ;;  %v62_v8 = vld [vmem:[%s2675_s2 + $0xe0] sm:$0xff]  ;;  %v432_v55 = vsub.s32 1, %v2132_v5 }
  0x10   :  { %1795 = vmatprep.subr.bf16.mxu1 %v1794_v43  ;;  %v44_v2 = vld [vmem:[%s2675_s2 + $0x50] sm:$0xff]  ;;  %v45_v3 = vld [vmem:[%s2675_s2 + $0x58] sm:$0xff]  ;;  %v1802_v6 = vpack.c.bf16 %v93_v62, %v92_v61  ;;  %v63_v9 = vld [vmem:[%s2675_s2 + $0xe8] sm:$0xff] }
  0x11   :  { %v76_v4 = vld [vmem:[%s2675_s2 + $0x150] sm:$0xff]  ;;  %v77_v7 = vld [vmem:[%s2675_s2 + $0x158] sm:$0xff]  ;;  %v94_v10 = vld [vmem:[%s2675_s2 + $0x1e0] sm:$0xff]  ;;  %v1772_v12 = vpack.c.bf16 %v45_v3, %v44_v2  ;;  %v1774_v17 = vpack.c.bf16 %v63_v9, %v62_v8 }
  0x12   :  { %1765 = vmatpush3.bf16.msra.mxu0 %v1764_v50  ;;  %v95_v11 = vld [vmem:[%s2675_s2 + $0x1e8] sm:$0xff]  ;;  %v46_v13 = vld [vmem:[%s2675_s2 + $0x60] sm:$0xff]  ;;  %v1804_v16 = vpack.c.bf16 %v77_v7, %v76_v4  ;;  %v31_v20 = vld [vmem:[%s2677_s1 + $0x18] sm:$0xff] }
  0x13   :  { %1797 = vmatpush3.bf16.msra.mxu1 %v1796_v51  ;;  %1767 = vmatprep.subr.bf16.mxu0 %v1766_v52  ;;  %v47_v14 = vld [vmem:[%s2675_s2 + $0x68] sm:$0xff]  ;;  %v78_v15 = vld [vmem:[%s2675_s2 + $0x160] sm:$0xff]  ;;  %v1806_v22 = vpack.c.bf16 %v95_v11, %v94_v10  ;;  %v64_v23 = vld [vmem:[%s2675_s2 + $0xf0] sm:$0xff] }
  0x14   :  { %1799 = vmatprep.subr.bf16.mxu1 %v1798_v57  ;;  %v79_v18 = vld [vmem:[%s2675_s2 + $0x168] sm:$0xff]  ;;  %v65_v24 = vld [vmem:[%s2675_s2 + $0xf8] sm:$0xff]  ;;  %v96_v25 = vld [vmem:[%s2675_s2 + $0x1f0] sm:$0xff]  ;;  %268 = vmatprep.mubr.f32.mxu1 %v31_v20  ;;  %v1776_v30 = vpack.c.bf16 %v47_v14, %v46_v13  ;;  %v443_v57 = vsub.s32 2, %v2132_v5 }
  0x15   :  { %v29_v19 = vld [vmem:[%s2677_s1 + $0x8] sm:$0xff]  ;;  %v97_v27 = vld [vmem:[%s2675_s2 + $0x1f8] sm:$0xff]  ;;  %v2184_v28 = vld [vmem:[%s2678_s5] sm:$0xff]  ;;  %v1808_v34 = vpack.c.bf16 %v79_v18, %v78_v15  ;;  %v1778_v35 = vpack.c.bf16 %v65_v24, %v64_v23  ;;  %v410_v15 = vsub.s32 7, %v2132_v5  ;;  %v132_v23 = vsub.s32 0, %v2132_v5 }
  0x16   :  { %1769 = vmatpush3.bf16.msra.mxu0 %v1768_v63  ;;  %198 = vmatprep.mubr.f32.mxu0 %v29_v19  ;;  %v25_v29 = vld [vmem:[%s2678_s5 + $0x8] sm:$0xff]  ;;  %v2192_v31 = vld [vmem:[%s2678_s5 + $0x10] sm:$0xff]  ;;  %v594_v32 = vrot.slane %v2184_v28, 1  ;;  %v49_v37 = vld [vmem:[%s2675_s2 + $0x78] sm:$0xff]  ;;  %v1810_v41 = vpack.c.bf16 %v97_v27, %v96_v25 }
  0x17   :  { %1801 = vmatpush3.bf16.msra.mxu1 %v1800_v0  ;;  %1771 = vmatprep.subr.bf16.mxu0 %v1770_v1  ;;  %v595_v33 = vrot.slane %v25_v29, 1  ;;  %v48_v36 = vld [vmem:[%s2675_s2 + $0x70] sm:$0xff]  ;;  %v597_v39 = vrot.slane %v2192_v31, 1  ;;  %v389_v40 = vrot.slane %v2192_v31, %v388_v21  ;;  %v81_v42 = vld [vmem:[%s2675_s2 + $0x178] sm:$0xff]  ;;  %v114_v43 = vld [vmem:[%s2675_s2 + $0x280] sm:$0xff]  ;;  %v378_v45 = vrot.slane %v2192_v31, %v377_v26 }
  0x18   :  { %1803 = vmatprep.subr.bf16.mxu1 %v1802_v6  ;;  %v80_v38 = vld [vmem:[%s2675_s2 + $0x170] sm:$0xff]  ;;  %v115_v44 = vld [vmem:[%s2675_s2 + $0x288] sm:$0xff]  ;;  %v2223_v48 = vld [vmem:[%s2678_s5 + $0x18] sm:$0xff]  ;;  %v1780_v50 = vpack.c.bf16 %v49_v37, %v48_v36  ;;  %v588_v59 = vrot.slane %v2192_v31, 3  ;;  %v367_v63 = vrot.slane %v2192_v31, %v366_v49  ;;  %v399_v0 = vsub.s32 6, %v2132_v5 }
  0x19   :  { %v596_v46 = vsel %vm593_vm0, %v594_v32, %v595_v33  ;;  %v598_v47 = vsel %vm593_vm0, %v595_v33, %v597_v39  ;;  %391 = vbcast.lane.b32.xlu1 %v389_v40, 256  ;;  %v1812_v51 = vpack.c.bf16 %v81_v42, %v80_v38  ;;  %v1814_v52 = vpack.c.bf16 %v115_v44, %v114_v43  ;;  %v98_v53 = vld [vmem:[%s2675_s2 + $0x200] sm:$0xff]  ;;  %v99_v54 = vld [vmem:[%s2675_s2 + $0x208] sm:$0xff]  ;;  %v116_v61 = vld [vmem:[%s2675_s2 + $0x290] sm:$0xff] }
  0x1a   :  { %1773 = vmatpush3.bf16.msra.mxu0 %v1772_v12  ;;  %v1846_v58 = vpack.c.bf16 %v598_v47, %v596_v46  ;;  %v589_v60 = vrot.slane %v2223_v48, 3  ;;  %380 = vbcast.lane.b32.xlu0 %v378_v45, 256  ;;  %v117_v62 = vld [vmem:[%s2675_s2 + $0x298] sm:$0xff]  ;;  %v2249_v1 = vrot.slane %v2192_v31, %v432_v55  ;;  %v2254_v2 = vrot.slane %v2192_v31, %v443_v57  ;;  %v28_v3 = vld [vmem:[%s2677_s1] sm:$0xff]  ;;  %v30_v6 = vld [vmem:[%s2677_s1 + $0x10] sm:$0xff] }
  0x1b   :  { %1805 = vmatpush3.bf16.msra.mxu1 %v1804_v16  ;;  %1775 = vmatprep.subr.bf16.mxu0 %v1774_v17  ;;  %v1816_v4 = vpack.c.bf16 %v99_v54, %v98_v53  ;;  %v100_v7 = vld [vmem:[%s2675_s2 + $0x210] sm:$0xff]  ;;  %v101_v8 = vld [vmem:[%s2675_s2 + $0x218] sm:$0xff]  ;;  %v1818_v10 = vpack.c.bf16 %v117_v62, %v116_v61  ;;  %v118_v11 = vld [vmem:[%s2675_s2 + $0x2a0] sm:$0xff]  ;;  %v400_v14 = vrot.slane %v2192_v31, %v399_v0 }
  0x1c   :  { %1807 = vmatprep.subr.bf16.mxu1 %v1806_v22  ;;  %v590_v9 = vsel %vm587_vm1, %v588_v59, %v589_v60  ;;  %v119_v12 = vld [vmem:[%s2675_s2 + $0x2a8] sm:$0xff]  ;;  %v1820_v16 = vpack.c.bf16 %v101_v8, %v100_v7  ;;  %v102_v18 = vld [vmem:[%s2675_s2 + $0x220] sm:$0xff]  ;;  %v120_v20 = vld [vmem:[%s2675_s2 + $0x2b0] sm:$0xff]  ;;  %v411_v22 = vrot.slane %v2192_v31, %v410_v15  ;;  %v422_v32 = vrot.slane %v2223_v48, %v132_v23 }
  0x1d   :  { %395 = vbcast.lane.b32.xlu1 %v389_v40, 264  ;;  %v33_v13 = vld [vmem:[%s2677_s1 + $0x28] sm:$0xff]  ;;  %v1822_v17 = vpack.c.bf16 %v119_v12, %v118_v11  ;;  %v121_v21 = vld [vmem:[%s2675_s2 + $0x2b8] sm:$0xff]  ;;  %v104_v27 = vld [vmem:[%s2675_s2 + $0x230] sm:$0xff]  ;;  %v433_v39 = vrot.slane %v2223_v48, %v432_v55  ;;  %v444_v46 = vrot.slane %v2223_v48, %v443_v57  ;;  %v466_v55 = vrot.slane %v2223_v48, %v377_v26 }
  0x1e   :  { %1777 = vmatpush3.bf16.msra.mxu0 %v1776_v30  ;;  %384 = vbcast.lane.b32.xlu0 %v378_v45, 264  ;;  %v103_v19 = vld [vmem:[%s2675_s2 + $0x228] sm:$0xff]  ;;  %v1826_v25 = vpack.c.bf16 %v121_v21, %v120_v20  ;;  %v105_v29 = vld [vmem:[%s2675_s2 + $0x238] sm:$0xff]  ;;  %v122_v30 = vld [vmem:[%s2675_s2 + $0x2c0] sm:$0xff]  ;;  %v455_v61 = vrot.slane %v2223_v48, %v366_v49 }
  0x1f   :  { %1809 = vmatpush3.bf16.msra.mxu1 %v1808_v34  ;;  %1779 = vmatprep.subr.bf16.mxu0 %v1778_v35  ;;  %v1824_v24 = vpack.c.bf16 %v103_v19, %v102_v18  ;;  %v123_v31 = vld [vmem:[%s2675_s2 + $0x2c8] sm:$0xff]  ;;  %v1828_v33 = vpack.c.bf16 %v105_v29, %v104_v27  ;;  %v106_v35 = vld [vmem:[%s2675_s2 + $0x240] sm:$0xff]  ;;  %v124_v37 = vld [vmem:[%s2675_s2 + $0x2d0] sm:$0xff] }
  0x20   :  { %1811 = vmatprep.subr.bf16.mxu1 %v1810_v41  ;;  %v1830_v34 = vpack.c.bf16 %v123_v31, %v122_v30  ;;  %v107_v36 = vld [vmem:[%s2675_s2 + $0x248] sm:$0xff]  ;;  %v125_v38 = vld [vmem:[%s2675_s2 + $0x2d8] sm:$0xff]  ;;  %v108_v42 = vld [vmem:[%s2675_s2 + $0x250] sm:$0xff] }
  0x21   :  { %373 = vbcast.lane.b32.xlu1 %v367_v63, 264  ;;  %v1832_v40 = vpack.c.bf16 %v107_v36, %v106_v35  ;;  %v1834_v41 = vpack.c.bf16 %v125_v38, %v124_v37  ;;  %v109_v43 = vld [vmem:[%s2675_s2 + $0x258] sm:$0xff]  ;;  %v126_v44 = vld [vmem:[%s2675_s2 + $0x2e0] sm:$0xff]  ;;  %v127_v45 = vld [vmem:[%s2675_s2 + $0x2e8] sm:$0xff] }
  0x22   :  { %1781 = vmatpush3.bf16.msra.mxu0 %v1780_v50  ;;  %369 = vbcast.lane.b32.xlu0 %v367_v63, 256  ;;  %v1836_v47 = vpack.c.bf16 %v109_v43, %v108_v42  ;;  %v1838_v50 = vpack.c.bf16 %v127_v45, %v126_v44  ;;  %v128_v53 = vld [vmem:[%s2675_s2 + $0x2f0] sm:$0xff]  ;;  %v129_v54 = vld [vmem:[%s2675_s2 + $0x2f8] sm:$0xff]  ;;  %v32_v62 = vld [vmem:[%s2677_s1 + $0x20] sm:$0xff] }
  0x23   :  { %1813 = vmatpush3.bf16.msra.mxu1 %v1812_v51  ;;  %1815 = vmatprep.subr.bf16.mxu0 %v1814_v52  ;;  %v110_v51 = vld [vmem:[%s2675_s2 + $0x260] sm:$0xff]  ;;  %v111_v52 = vld [vmem:[%s2675_s2 + $0x268] sm:$0xff]  ;;  %v112_v59 = vld [vmem:[%s2675_s2 + $0x270] sm:$0xff] }
  0x24   :  { %1847 = vmatprep.subr.bf16.mxu1 %v1846_v58  ;;  %v1840_v57 = vpack.c.bf16 %v111_v52, %v110_v51  ;;  %v346_v18 = vld [vmem:[%s2679_s3 + $0x10] sm:$0xff]  ;;  %v344_v29 = vld [vmem:[%s2679_s3] sm:$0xff]  ;;  %v351_v30 = vld [vmem:[%s2679_s3 + $0x38] sm:$0xff] }
  0x25   :  { %199 = vmatmul.mubr.f32.vlgmr.msra.gmra.mrb[0].mxu0 %v28_v3  ;;  %406 = vbcast.lane.b32.xlu1 %v400_v14, 264  ;;  %v350_v31 = vld [vmem:[%s2679_s3 + $0x30] sm:$0xff]  ;;  %v352_v38 = vld [vmem:[%s2679_s3 + $0x40] sm:$0xff]  ;;  %vm1860_vm15 = vmpackc.low %vm1004_vm13, %vm1004_vm13 }
  0x26   :  { %269 = vmatmul.mubr.f32.vlgmr.msra.gmra.mrb[0].mxu1 %v30_v6  ;;  %1817 = vmatpush3.bf16.msra.mxu0 %v1816_v4 }
  0x27   :  { %1849 = vmatpush3.bf16.msra.mxu1 %v1846_v58  ;;  %1717 = vmatprep.mubr.msk.f32.mxu1 %vm601_vm2, %v590_v9  ;;  %v1842_v58 = vpack.c.bf16 %v129_v54, %v128_v53 }
  0x28   :  { %1819 = vmatprep.subr.bf16.mxu0 %v1818_v10  ;;  %338 = vmatprep.mubr.f32.mxu0 %v33_v13 }
  0x29   :  { %402 = vbcast.lane.b32.xlu0 %v400_v14, 256  ;;  %417 = vbcast.lane.b32.xlu1 %v411_v22, 264 }
  0x2a   :  { %1718 = vmatmul.mubr.msk.f32.vlgmr.msra.gmra.mrb[2].mxu1 %vm601_vm2, %v589_v60  ;;  %1821 = vmatpush3.bf16.msra.mxu0 %v1820_v16  ;;  %v113_v60 = vld [vmem:[%s2675_s2 + $0x278] sm:$0xff]  ;;  %v348_v16 = vld [vmem:[%s2679_s3 + $0x20] sm:$0xff] }
  0x2b   :  { %1823 = vmatprep.subr.bf16.mxu0 %v1822_v17  ;;  %v1844_v26 = vpack.c.bf16 %v113_v60, %v112_v59  ;;  %v349_v17 = vld [vmem:[%s2679_s3 + $0x28] sm:$0xff]  ;;  %v359_v59 = vld [vmem:[%s2679_s3 + $0x78] sm:$0xff]  ;;  %v358_v60 = vld [vmem:[%s2679_s3 + $0x70] sm:$0xff] }
  0x2d   :  { %413 = vbcast.lane.b32.xlu0 %v411_v22, 256  ;;  %428 = vbcast.lane.b32.xlu1 %v422_v32, 264 }
  0x2e   :  { %1825 = vmatpush3.bf16.msra.mxu0 %v1824_v24  ;;  %v347_v24 = vld [vmem:[%s2679_s3 + $0x18] sm:$0xff] }
  0x2f   :  { %1827 = vmatprep.subr.bf16.mxu0 %v1826_v25  ;;  %v345_v25 = vld [vmem:[%s2679_s3 + $0x8] sm:$0xff] }
  0x31   :  { %424 = vbcast.lane.b32.xlu0 %v422_v32, 256  ;;  %439 = vbcast.lane.b32.xlu1 %v433_v39, 264  ;;  %v353_v32 = vld [vmem:[%s2679_s3 + $0x48] sm:$0xff] }
  0x32   :  { %1829 = vmatpush3.bf16.msra.mxu0 %v1828_v33  ;;  %v363_v33 = vld [vmem:[%s2679_s3 + $0x98] sm:$0xff] }
  0x33   :  { %1831 = vmatprep.subr.bf16.mxu0 %v1830_v34  ;;  %v362_v34 = vld [vmem:[%s2679_s3 + $0x90] sm:$0xff] }
  0x35   :  { %435 = vbcast.lane.b32.xlu0 %v433_v39, 256  ;;  %450 = vbcast.lane.b32.xlu1 %v444_v46, 264  ;;  %v355_v39 = vld [vmem:[%s2679_s3 + $0x58] sm:$0xff] }
  0x36   :  { %1833 = vmatpush3.bf16.msra.mxu0 %v1832_v40  ;;  %v354_v40 = vld [vmem:[%s2679_s3 + $0x50] sm:$0xff] }
  0x37   :  { %1835 = vmatprep.subr.bf16.mxu0 %v1834_v41 }
  0x39   :  { %446 = vbcast.lane.b32.xlu0 %v444_v46, 256  ;;  %472 = vbcast.lane.b32.xlu1 %v466_v55, 264  ;;  %v361_v46 = vld [vmem:[%s2679_s3 + $0x88] sm:$0xff] }
  0x3a   :  { %1837 = vmatpush3.bf16.msra.mxu0 %v1836_v47 }
  0x3b   :  { %1839 = vmatprep.subr.bf16.mxu0 %v1838_v50  ;;  %v360_v50 = vld [vmem:[%s2679_s3 + $0x80] sm:$0xff] }
  0x3d   :  { %468 = vbcast.lane.b32.xlu0 %v466_v55, 256  ;;  %461 = vbcast.lane.b32.xlu1 %v455_v61, 264 }
  0x3e   :  { %1841 = vmatpush3.bf16.msra.mxu0 %v1840_v57 }
  0x3f   :  { %1843 = vmatprep.subr.bf16.mxu0 %v1842_v58 }
  0x41   :  { %457 = vbcast.lane.b32.xlu0 %v455_v61, 256 }
  0x42   :  { %1845 = vmatpush3.bf16.msra.mxu0 %v1844_v26 }
  0x45   :  { %339 = vmatmul.mubr.f32.vlgmr.msra.gmra.mrb[2].mxu0 %v32_v62 }
  0x8b   :  { %v392_v63 = vpop.permute.xlu1 %391 }
  0x8c   :  { %v381_v0 = vpop.permute.xlu0 %380  ;;  %v478_v21 = vmul.f32 %v392_v63, %v348_v16 }
  0x8d   :  { %v476_v27 = vmul.f32 %v381_v0, %v346_v18 }
  0x8e   :  { %v513_v35 = vsel %vm494_vm3, %v478_v21, 0.0 }
  0x8f   :  { %v396_v3 = vpop.permute.xlu1 %395  ;;  %v504_v51 = vsel %vm494_vm3, %v476_v27, 0.0 }
  0x90   :  { %v385_v4 = vpop.permute.xlu0 %384  ;;  %v479_v22 = vmul.f32 %v396_v3, %v349_v17 }
  0x91   :  { %v477_v37 = vmul.f32 %v385_v4, %v347_v24 }
  0x92   :  { %v514_v36 = vsel %vm494_vm3, %v479_v22, 0.0 }
  0x93   :  { %v374_v6 = vpop.permute.xlu1 %373  ;;  %v515_v61 = vadd.f32 %v514_v36, %v513_v35  ;;  %v505_v26 = vsel %vm494_vm3, %v477_v37, 0.0 }
  0x94   :  { %v370_v7 = vpop.permute.xlu0 %369  ;;  %v475_v41 = vmul.f32 %v374_v6, %v345_v25 }
  0x95   :  { %v474_v42 = vmul.f32 %v370_v7, %v344_v29  ;;  %v357_v7 = vld [vmem:[%s2679_s3 + $0x68] sm:$0xff] }
  0x96   :  { %v496_v0 = vsel %vm494_vm3, %v475_v41, 0.0 }
  0x97   :  { %v407_v8 = vpop.permute.xlu1 %406  ;;  %v495_v3 = vsel %vm494_vm3, %v474_v42, 0.0 }
  0x98   :  { %v481_v43 = vmul.f32 %v407_v8, %v351_v30  ;;  %v356_v8 = vld [vmem:[%s2679_s3 + $0x60] sm:$0xff]  ;;  %v497_v22 = vadd.f32 %v496_v0, %v495_v3 }
  0x9a   :  { %v523_v4 = vsel %vm494_vm3, %v481_v43, 0.0  ;;  %v498_v37 = vrot.slane %v497_v22, 4 }
  0x9b   :  { %v403_v48 = vpop.permute.xlu0 %402  ;;  %v418_v49 = vpop.permute.xlu1 %417 }
  0x9c   :  { %v480_v44 = vmul.f32 %v403_v48, %v350_v31  ;;  %v483_v54 = vmul.f32 %v418_v49, %v353_v32 }
  0x9e   :  { %v522_v6 = vsel %vm494_vm3, %v480_v44, 0.0 }
  0x9f   :  { %v414_v9 = vpop.permute.xlu0 %413  ;;  %v429_v10 = vpop.permute.xlu1 %428  ;;  %v524_v24 = vadd.f32 %v523_v4, %v522_v6 }
  0xa0   :  { %v482_v55 = vmul.f32 %v414_v9, %v352_v38  ;;  %v485_v57 = vmul.f32 %v429_v10, %v355_v39 }
  0xa1   :  { %v525_v38 = vrot.slane %v524_v24, 4 }
  0xa2   :  { %v531_v16 = vsel %vm494_vm3, %v482_v55, 0.0  ;;  %v541_v17 = vsel %vm494_vm3, %v485_v57, 0.0 }
  0xa3   :  { %v425_v11 = vpop.permute.xlu0 %424  ;;  %v2368_v12 = vpop.permute.xlu1 %439 }
  0xa4   :  { %v484_v58 = vmul.f32 %v425_v11, %v354_v40  ;;  %v532_v11 = vsel %vm494_vm3, %v483_v54, 0.0 }
  0xa5   :  { %v533_v27 = vadd.f32 %v532_v11, %v531_v16 }
  0xa6   :  { %v540_v18 = vsel %vm494_vm3, %v484_v58, 0.0 }
  0xa7   :  { %v2370_v13 = vpop.permute.xlu0 %435  ;;  %v451_v14 = vpop.permute.xlu1 %450  ;;  %v542_v29 = vadd.f32 %v541_v17, %v540_v18  ;;  %v534_v39 = vrot.slane %v533_v27, 4 }
  0xa8   :  { %v489_v48 = vmul.f32 %v451_v14, %v359_v59 }
  0xa9   :  { %v543_v40 = vrot.slane %v542_v29, 4 }
  0xaa   :  { %v559_v30 = vsel %vm494_vm3, %v489_v48, 0.0 }
  0xab   :  { %v447_v15 = vpop.permute.xlu0 %446  ;;  %v473_v19 = vpop.permute.xlu1 %472 }
  0xac   :  { %v493_v52 = vmul.f32 %v473_v19, %v363_v33  ;;  %v488_v49 = vmul.f32 %v447_v15, %v358_v60  ;;  %v487_v19 = vmul.f32 %v2368_v12, %v357_v7  ;;  %v506_v15 = vadd.f32 %v505_v26, %v504_v51 }
  0xad   :  { %v516_v33 = vrot.slane %v515_v61, 4  ;;  %v535_v51 = vadd.f32 %v534_v39, %v533_v27 }
  0xae   :  { %v577_v9 = vsel %vm494_vm3, %v493_v52, 0.0  ;;  %v558_v31 = vsel %vm494_vm3, %v488_v49, 0.0  ;;  %v550_v12 = vsel %vm494_vm3, %v487_v19, 0.0  ;;  %v544_v52 = vadd.f32 %v543_v40, %v542_v29 }
  0xaf   :  { %v469_v20 = vpop.permute.xlu0 %468  ;;  %v462_v45 = vpop.permute.xlu1 %461  ;;  %v560_v35 = vadd.f32 %v559_v30, %v558_v31  ;;  %v517_v43 = vadd.f32 %v516_v33, %v515_v61 }
  0xb0   :  { %v492_v53 = vmul.f32 %v469_v20, %v362_v34  ;;  %v491_v62 = vmul.f32 %v462_v45, %v361_v46  ;;  %v486_v20 = vmul.f32 %v2370_v13, %v356_v8  ;;  %v507_v34 = vrot.slane %v506_v15, 4 }
  0xb1   :  { %v561_v45 = vrot.slane %v560_v35, 4  ;;  %v518_v55 = vrot.slane %v517_v43, 2 }
  0xb2   :  { %v576_v10 = vsel %vm494_vm3, %v492_v53, 0.0  ;;  %v568_v21 = vsel %vm494_vm3, %v491_v62, 0.0  ;;  %v549_v13 = vsel %vm494_vm3, %v486_v20, 0.0  ;;  %v508_v44 = vadd.f32 %v507_v34, %v506_v15 }
  0xb3   :  { %v458_v47 = vpop.permute.xlu0 %457  ;;  %v578_v25 = vadd.f32 %v577_v9, %v576_v10  ;;  %v551_v41 = vadd.f32 %v550_v12, %v549_v13  ;;  %v562_v58 = vadd.f32 %v561_v45, %v560_v35  ;;  %v536_v62 = vrot.slane %v535_v51, 2 }
  0xb4   :  { %v490_v63 = vmul.f32 %v458_v47, %v360_v50  ;;  %v499_v47 = vadd.f32 %v498_v37, %v497_v22  ;;  %v526_v50 = vadd.f32 %v525_v38, %v524_v24  ;;  %v509_v57 = vrot.slane %v508_v44, 2 }
  0xb5   :  { %v579_v36 = vrot.slane %v578_v25, 4  ;;  %v552_v53 = vrot.slane %v551_v41, 4  ;;  %v519_v61 = vadd.f32 %v518_v55, %v517_v43  ;;  %v563_v6 = vrot.slane %v562_v58, 2 }
  0xb6   :  { %v567_v14 = vsel %vm494_vm3, %v490_v63, 0.0  ;;  %v500_v60 = vrot.slane %v499_v47, 2  ;;  %v527_v26 = vrot.slane %v526_v50, 2  ;;  %v545_v63 = vrot.slane %v544_v52, 2 }
  0xb7   :  { %v569_v32 = vadd.f32 %v568_v21, %v567_v14  ;;  %v580_v46 = vadd.f32 %v579_v36, %v578_v25  ;;  %v553_v0 = vadd.f32 %v552_v53, %v551_v41  ;;  %v510_v4 = vadd.f32 %v509_v57, %v508_v44 }
  0xb8   :  { %v501_v8 = vadd.f32 %v500_v60, %v499_v47  ;;  %v528_v48 = vadd.f32 %v527_v26, %v526_v50  ;;  %v537_v49 = vadd.f32 %v536_v62, %v535_v51  ;;  %v546_v9 = vadd.f32 %v545_v63, %v544_v52 }
  0xb9   :  { %v570_v42 = vrot.slane %v569_v32, 4  ;;  %v581_v59 = vrot.slane %v580_v46, 2  ;;  %v554_v10 = vrot.slane %v553_v0, 2  ;;  %v520_v16 = vrot.slane %v519_v61, 1 }
  0xba   :  { %v511_v17 = vrot.slane %v510_v4, 1  ;;  %v564_v18 = vadd.f32 %v563_v6, %v562_v58  ;;  %v133_v20 = vrot.slane %v2184_v28, %v132_v23  ;;  %v502_v14 = vrot.slane %v501_v8, 1 }
  0xbb   :  { %v571_v54 = vadd.f32 %v570_v42, %v569_v32  ;;  %v582_v7 = vadd.f32 %v581_v59, %v580_v46  ;;  %v529_v15 = vrot.slane %v528_v48, 1  ;;  %v538_v22 = vrot.slane %v537_v49, 1 }
  0xbc   :  { %v547_v24 = vrot.slane %v546_v9, 1  ;;  %v555_v29 = vadd.f32 %v554_v10, %v553_v0  ;;  %v521_v33 = vadd.f32 %v520_v16, %v519_v61  ;;  %v512_v13 = vadd.f32 %v511_v17, %v510_v4 }
  0xbd   :  { %v572_v3 = vrot.slane %v571_v54, 2  ;;  %v583_v21 = vrot.slane %v582_v7, 1  ;;  %v565_v34 = vrot.slane %v564_v18, 1  ;;  %v503_v23 = vadd.f32 %v502_v14, %v501_v8 }
  0xbe   :  { %v530_v36 = vadd.f32 %v529_v15, %v528_v48  ;;  %v539_v37 = vadd.f32 %v538_v22, %v537_v49  ;;  %v548_v38 = vadd.f32 %v547_v24, %v546_v9  ;;  %v556_v40 = vrot.slane %v555_v29, 1 }
  0xbf   :  { %v573_v11 = vadd.f32 %v572_v3, %v571_v54  ;;  %v584_v28 = vadd.f32 %v583_v21, %v582_v7  ;;  %v566_v51 = vadd.f32 %v565_v34, %v564_v18 }
  0xc0   :  { %v557_v60 = vadd.f32 %v556_v40, %v555_v29 }
  0xc1   :  { %v574_v32 = vrot.slane %v573_v11, 1 }
  0xc3   :  { %v575_v42 = vadd.f32 %v574_v32, %v573_v11 }
  0xf8   :  { %v1622_v19 = vpop.f32.mrb[0].mxu0 }
  0xf9   :  { %v1657_v25 = vpop.f32.mrb[0].mxu1  ;;  %v1623_v27 = vpop.f32.mrb[1].mxu0 }
  0xfa   :  { %v1624_v30 = vadd.f32 %v1623_v27, %v1622_v19  ;;  %v1658_v31 = vpop.f32.mrb[1].mxu1 }
  0xfb   :  { %v1659_v12 = vadd.f32 %v1658_v31, %v1657_v25 }
  0xfc   :  { %v201_v35 = vadd.f32 %v1624_v30, %v133_v20 }
  0xfd   :  { %v1719_v39 = vpop.f32.mrb[2].mxu1 }
  0xfe   :  { %v271_v41 = vadd.f32 %v1659_v12, %v201_v35  ;;  %v690_v43 = vrot.slane %v1719_v39, 1  ;;  %v672_v44 = vpop.f32.mrb[3].mxu1  ;;  %v2457_v26 = vadd.f32 %v1719_v39, %v575_v42 }
  0xff   :  { %v683_v45 = vrot.slane %v672_v44, 1  ;;  %v684_v46 = vrot.slane %v672_v44, 2  ;;  %v685_v47 = vrot.slane %v672_v44, 3  ;;  %v686_v50 = vrot.slane %v672_v44, 4 }
 0x100   :  { %v710_v52 = vadd.f32 %v690_v43, %v584_v28  ;;  %v687_v53 = vrot.slane %v672_v44, 5  ;;  %v688_v54 = vrot.slane %v672_v44, 6  ;;  %v689_v55 = vrot.slane %v672_v44, 7 }
 0x101   :  { %v702_v57 = vadd.f32 %v683_v45, %v512_v13  ;;  %v703_v58 = vadd.f32 %v684_v46, %v521_v33  ;;  %v704_v59 = vadd.f32 %v685_v47, %v530_v36  ;;  %v705_v63 = vadd.f32 %v686_v50, %v539_v37 }
 0x102   :  { %v742_v62 = vrot.slane %v710_v52, 7  ;;  %v701_v0 = vadd.f32 %v672_v44, %v503_v23  ;;  %v706_v3 = vadd.f32 %v687_v53, %v548_v38  ;;  %v707_v7 = vadd.f32 %v688_v54, %v557_v60 }
 0x103   :  { %v721_v61 = vrot.slane %v702_v57, 7  ;;  %v724_v4 = vrot.slane %v703_v58, 6  ;;  %v708_v48 = vadd.f32 %v689_v55, %v566_v51  ;;  %v727_v9 = vrot.slane %v704_v59, 5 }
 0x104   :  { %v743_v6 = vsel %vm722_vm4, %v742_v62, %v2457_v26  ;;  %v730_v11 = vrot.slane %v705_v63, 4  ;;  %v733_v17 = vrot.slane %v706_v3, 3  ;;  %v736_v19 = vrot.slane %v707_v7, 2 }
 0x105   :  { %v750_v8 = vsel %vm749_vm5, %v743_v6, 0.0  ;;  %v723_v49 = vsel %vm722_vm4, %v721_v61, %v701_v0  ;;  %v739_v21 = vrot.slane %v708_v48, 1 }
 0x106   :  { %751 = vadd.xlane.f32.xlu1 %v750_v8  ;;  %v726_v10 = vsel %vm725_vm6, %v724_v4, %v723_v49 }
 0x107   :  { %v729_v16 = vsel %vm728_vm7, %v727_v9, %v726_v10 }
 0x108   :  { %v732_v18 = vsel %vm731_vm8, %v730_v11, %v729_v16 }
 0x109   :  { %v735_v20 = vsel %vm734_vm9, %v733_v17, %v732_v18 }
 0x10a   :  { %v738_v14 = vsel %vm737_vm10, %v736_v19, %v735_v20  ;;  %v894_v19 = vld [vmem:[%s2680_s4] sm:$0xff]  ;;  %v895_v20 = vld [vmem:[%s2680_s4 + $0x8] sm:$0xff] }
 0x10b   :  { %v741_v15 = vsel %vm740_vm11, %v739_v21, %v738_v14  ;;  %v896_v21 = vld [vmem:[%s2680_s4 + $0x10] sm:$0xff]  ;;  %v1850_v14 = vpack.c.bf16 %v895_v20, %v894_v19 }
 0x10c   :  { %v746_v22 = vsel %vm494_vm3, %v741_v15, 0.0  ;;  %v897_v15 = vld [vmem:[%s2680_s4 + $0x18] sm:$0xff]  ;;  %s2588_s4 = smov 0  }
 0x10d   :  { %747 = vadd.xlane.f32.xlu0 %v746_v22  ;;  %v1854_v22 = vpack.c.bf16 %v897_v15, %v896_v21  ;;  %1851 = vmatprep.subr.bf16.mxu1 %v1850_v14 }
 0x10e   :  { %1853 = vmatpush3.bf16.msra.mxu1 %v1850_v14 }
 0x10f   :  { %1855 = vmatprep.subr.bf16.mxu1 %v1854_v22 }
 0x112   :  { %1857 = vmatpush3.bf16.msra.mxu1 %v1854_v22 }
 0x118   :  { %v1692_v24 = vpop.f32.mrb[2].mxu0 }
 0x119   :  { %v1693_v25 = vpop.f32.mrb[3].mxu0 }
 0x11a   :  { %v1694_v27 = vadd.f32 %v1693_v25, %v1692_v24 }
 0x11c   :  { %v2470_v29 = vadd.f32 %v1694_v27, %v271_v41 }
 0x193   :  { %v752_v30 = vpop.xlane.xlu1 %751 }
 0x194   :  { %v755_v31 = vmul.f32 0.03125, %v752_v30 }
 0x196   :  { %v765_v12 = vrot.slane %v755_v31, 1  ;;  %v784_v61 = vsub.f32 %v2457_v26, %v755_v31 }
 0x198   :  { %v2482_v43 = vsub.f32 %v710_v52, %v765_v12  ;;  %v794_v11 = vmul.f32 %v784_v61, %v784_v61 }
 0x19a   :  { %v748_v32 = vpop.xlane.xlu0 %747 }
 0x19b   :  { %v754_v33 = vmul.f32 0.03125, %v748_v32 }
 0x19d   :  { %v758_v13 = vrot.slane %v754_v33, 1  ;;  %v759_v34 = vrot.slane %v754_v33, 2  ;;  %v760_v35 = vrot.slane %v754_v33, 3  ;;  %v761_v28 = vrot.slane %v754_v33, 4 }
 0x19e   :  { %v762_v23 = vrot.slane %v754_v33, 5  ;;  %v763_v36 = vrot.slane %v754_v33, 6  ;;  %v764_v37 = vrot.slane %v754_v33, 7  ;;  %v2472_v38 = vsub.f32 %v701_v0, %v754_v33 }
 0x19f   :  { %v2474_v39 = vsub.f32 %v702_v57, %v758_v13  ;;  %v2476_v40 = vsub.f32 %v703_v58, %v759_v34  ;;  %v2478_v41 = vsub.f32 %v704_v59, %v760_v35  ;;  %v2480_v42 = vsub.f32 %v705_v63, %v761_v28 }
 0x1a0   :  { %v2484_v44 = vsub.f32 %v706_v3, %v762_v23  ;;  %v2486_v45 = vsub.f32 %v707_v7, %v763_v36  ;;  %v2488_v46 = vsub.f32 %v708_v48, %v764_v37  ;;  %v786_v52 = vmul.f32 %v2472_v38, %v2472_v38 }
 0x1a1   :  { %v787_v47 = vmul.f32 %v2474_v39, %v2474_v39  ;;  %v788_v50 = vmul.f32 %v2476_v40, %v2476_v40  ;;  %v789_v51 = vmul.f32 %v2478_v41, %v2478_v41  ;;  %v790_v53 = vmul.f32 %v2480_v42, %v2480_v42 }
 0x1a2   :  { %v791_v54 = vmul.f32 %v2484_v44, %v2484_v44  ;;  %v792_v58 = vmul.f32 %v2486_v45, %v2486_v45  ;;  %v793_v59 = vmul.f32 %v2488_v46, %v2488_v46  ;;  %v795_v63 = vmul.f32 %v2482_v43, %v2482_v43 }
 0x1a3   :  { %v806_v55 = vrot.slane %v787_v47, 7  ;;  %v808_v57 = vrot.slane %v788_v50, 6  ;;  %v810_v62 = vrot.slane %v789_v51, 5  ;;  %v812_v3 = vrot.slane %v790_v53, 4 }
 0x1a4   :  { %v814_v6 = vrot.slane %v791_v54, 3  ;;  %v816_v8 = vrot.slane %v792_v58, 2  ;;  %v818_v49 = vrot.slane %v793_v59, 1  ;;  %v820_v9 = vrot.slane %v795_v63, 7 }
 0x1a5   :  { %v807_v60 = vsel %vm722_vm4, %v806_v55, %v786_v52 }
 0x1a6   :  { %v809_v0 = vsel %vm725_vm6, %v808_v57, %v807_v60  ;;  %v821_v26 = vsel %vm722_vm4, %v820_v9, %v794_v11 }
 0x1a7   :  { %v811_v4 = vsel %vm728_vm7, %v810_v62, %v809_v0  ;;  %v827_v18 = vsel %vm749_vm5, %v821_v26, 0.0 }
 0x1a8   :  { %v813_v7 = vsel %vm731_vm8, %v812_v3, %v811_v4 }
 0x1a9   :  { %v815_v48 = vsel %vm734_vm9, %v814_v6, %v813_v7 }
 0x1aa   :  { %v817_v10 = vsel %vm737_vm10, %v816_v8, %v815_v48 }
 0x1ab   :  { %v819_v16 = vsel %vm740_vm11, %v818_v49, %v817_v10 }
 0x1ac   :  { %v824_v17 = vsel %vm494_vm3, %v819_v16, 0.0 }
 0x1ad   :  { %825 = vadd.xlane.f32.xlu0 %v824_v17 }
 0x1b1   :  { %828 = vadd.xlane.f32.xlu0 %v827_v18 }
 0x23a   :  { %v826_v24 = vpop.xlane.xlu0 %825 }
 0x23b   :  { %v830_v25 = vmul.f32 0.03125, %v826_v24 }
 0x23d   :  { %v832_v27 = vadd.f32 1e-05, %v830_v25 }
 0x23e   :  { %v829_v30 = vpop.xlane.xlu0 %828 }
 0x23f   :  { %1892 = vrsqrt.f32 %v832_v27  ;;  %v831_v31 = vmul.f32 0.03125, %v829_v30 }
 0x241   :  { %v833_v32 = vadd.f32 1e-05, %v831_v31 }
 0x243   :  { %1894 = vrsqrt.f32 %v833_v32 }
 0x249   :  { %v1893_v33 = vpop.eup %1892 }
 0x24a   :  { %v838_v12 = vrot.slane %v1893_v33, 1  ;;  %v839_v13 = vrot.slane %v1893_v33, 2  ;;  %v840_v34 = vrot.slane %v1893_v33, 3  ;;  %v841_v35 = vrot.slane %v1893_v33, 4 }
 0x24b   :  { %v842_v28 = vrot.slane %v1893_v33, 5  ;;  %v843_v23 = vrot.slane %v1893_v33, 6  ;;  %v844_v36 = vrot.slane %v1893_v33, 7  ;;  %v856_v37 = vmul.f32 %v1893_v33, %v2472_v38 }
 0x24c   :  { %v857_v47 = vmul.f32 %v838_v12, %v2474_v39  ;;  %v858_v50 = vmul.f32 %v839_v13, %v2476_v40  ;;  %v859_v51 = vmul.f32 %v840_v34, %v2478_v41  ;;  %v860_v53 = vmul.f32 %v841_v35, %v2480_v42 }
 0x24d   :  { %v1895_v52 = vpop.eup %1894  ;;  %v861_v54 = vmul.f32 %v842_v28, %v2484_v44  ;;  %v862_v55 = vmul.f32 %v843_v23, %v2486_v45  ;;  %v863_v57 = vmul.f32 %v844_v36, %v2488_v46  ;;  %v870_v58 = vmul.f32 %v2249_v1, %v856_v37 }
 0x24e   :  { %v845_v59 = vrot.slane %v1895_v52, 1  ;;  %v864_v60 = vmul.f32 %v1895_v52, %v784_v61  ;;  %v871_v38 = vmul.f32 %v2249_v1, %v857_v47  ;;  %v872_v39 = vmul.f32 %v2249_v1, %v858_v50 }
 0x24f   :  { %v873_v40 = vmul.f32 %v2249_v1, %v859_v51  ;;  %v874_v41 = vmul.f32 %v2249_v1, %v860_v53  ;;  %v875_v42 = vmul.f32 %v2249_v1, %v861_v54  ;;  %v876_v44 = vmul.f32 %v2249_v1, %v862_v55 }
 0x250   :  { %v865_v45 = vmul.f32 %v845_v59, %v2482_v43  ;;  %v877_v46 = vmul.f32 %v2249_v1, %v863_v57  ;;  %v884_v62 = vadd.f32 %v2254_v2, %v870_v58  ;;  %v885_v63 = vadd.f32 %v2254_v2, %v871_v38 }
 0x251   :  { %v886_v0 = vadd.f32 %v2254_v2, %v872_v39  ;;  %v887_v3 = vadd.f32 %v2254_v2, %v873_v40  ;;  %v888_v61 = vadd.f32 %v2254_v2, %v874_v41  ;;  %v889_v4 = vadd.f32 %v2254_v2, %v875_v42 }
 0x252   :  { %v890_v6 = vadd.f32 %v2254_v2, %v876_v44  ;;  %v891_v7 = vadd.f32 %v2254_v2, %v877_v46  ;;  %v908_v8 = vrot.slane %v885_v63, 7  ;;  %v878_v43 = vmul.f32 %v2249_v1, %v864_v60 }
 0x253   :  { %v910_v48 = vrot.slane %v886_v0, 6  ;;  %v912_v9 = vrot.slane %v887_v3, 5  ;;  %v879_v10 = vmul.f32 %v2249_v1, %v865_v45  ;;  %v914_v16 = vrot.slane %v888_v61, 4 }
 0x254   :  { %v909_v49 = vsel %vm722_vm4, %v908_v8, %v884_v62  ;;  %v892_v17 = vadd.f32 %v2254_v2, %v878_v43  ;;  %v916_v18 = vrot.slane %v889_v4, 3  ;;  %v918_v21 = vrot.slane %v890_v6, 2 }
 0x255   :  { %v911_v11 = vsel %vm725_vm6, %v910_v48, %v909_v49  ;;  %v893_v19 = vadd.f32 %v2254_v2, %v879_v10  ;;  %v920_v15 = vrot.slane %v891_v7, 1  ;;  %v1003_v12 = vmul.f32 %v2470_v29, %v2470_v29 }
 0x256   :  { %v913_v26 = vsel %vm728_vm7, %v912_v9, %v911_v11  ;;  %v1944_v34 = vmov 0.0|0.0   ;;  %v1946_v35 = vmov 0.0   ;;  %v2586_v42 = vmov 1.0  }
 0x257   :  { %v915_v20 = vsel %vm731_vm8, %v914_v16, %v913_v26  ;;  %v922_v22 = vrot.slane %v893_v19, 7  ;;  %v1005_v13 = vsel %vm1004_vm13, %v1003_v12, 0.0  ;;  %1858 = vmatprep.subr.bf16.mxu1 %v1944_v34 }
 0x258   :  { %v917_v14 = vsel %vm734_vm9, %v916_v18, %v915_v20 }
 0x259   :  { %v919_v24 = vsel %vm737_vm10, %v918_v21, %v917_v14  ;;  %v923_v25 = vsel %vm722_vm4, %v922_v22, %v892_v17 }
 0x25a   :  { %v921_v1 = vsel %vm740_vm11, %v920_v15, %v919_v24 }
 0x25b   :  { %1728 = vmatprep.mubr.msk.f32.mxu1 %vm494_vm3, %v921_v1 }
 0x25c   :  { %1729 = vmatmul.mubr.msk.f32.vlgmr.msra.gmra.mrb[4].mxu1 %vm494_vm3, %v923_v25 }
 0x25d   :  { %1735 = vmatprep.mubr.msk.f32.mxu1 %vm2681_vm14, %v1946_v35 }
 0x32f   :  { %v1730_v27 = vpop.f32.mrb[4].mxu1 }
 0x330   :  { %v1012_v2 = vmul.f32 %v1730_v27, %v1730_v27  ;;  %v994_v30 = vpop.f32.mrb[5].mxu1 }
 0x331   :  { %v1011_v31 = vmul.f32 %v994_v30, %v994_v30 }
 0x332   :  { %v1017_v32 = vsel %vm1016_vm12, %v1012_v2, 0.0 }
 0x333   :  { %1018 = vadd.xlane.f32.xlu0 %v1017_v32  ;;  %v1013_v33 = vsel %vm1004_vm13, %v1011_v31, 0.0 }
 0x334   :  { %1014 = vadd.xlane.f32.xlu1 %v1013_v33 }
 0x338   :  { %1006 = vadd.xlane.f32.xlu1 %v1005_v13 }
 0x3c0   :  { %v1019_v28 = vpop.xlane.xlu0 %1018 }
 0x3c1   :  { %v1021_v23 = vmax.f32 %v1019_v28, 1e-24  ;;  %v1015_v36 = vpop.xlane.xlu1 %1014 }
 0x3c2   :  { %v1020_v37 = vmax.f32 %v1015_v36, 1e-24 }
 0x3c3   :  { %1896 = vrsqrt.f32 %v1021_v23 }
 0x3c4   :  { %1898 = vrsqrt.f32 %v1020_v37 }
 0x3c5   :  { %v1007_v47 = vpop.xlane.xlu1 %1006 }
 0x3c6   :  { %v1008_v50 = vmax.f32 %v1007_v47, 1e-24 }
 0x3c8   :  { %1900 = vrsqrt.f32 %v1008_v50 }
 0x3cd   :  { %v1897_v51 = vpop.eup %1896 }
 0x3ce   :  { %v1899_v53 = vpop.eup %1898  ;;  %v1025_v52 = vmul.f32 %v1897_v51, %v1730_v27 }
 0x3cf   :  { %v1024_v54 = vmul.f32 %v1899_v53, %v994_v30 }
 0x3d1   :  { %v1859_v55 = vpack.c.bf16 %v1025_v52, %v1024_v54 }
 0x3d2   :  { %v1901_v57 = vpop.eup %1900 }
 0x3d3   :  { %1861 = vmatpush3.bf16.xpose.msk.msra.mxu1 %vm1860_vm15, %v1859_v55  ;;  %v1010_v58 = vmul.f32 %v1901_v57, %v2470_v29 }
 0x3da   :  { %1736 = vmatmul.mubr.msk.f32.vlgmr.msra.gmra.mrb[6].mxu1 %vm1004_vm13, %v1010_v58 }
 0x4ad   :  { %v2581_v59 = vpop.f32.mrb[6].mxu1 }
 0x4ae   :  { %v1582_v60 = vadd.f32 -1.0, %v2581_v59  ;;  %v1737_v38 = vpop.f32.mrb[7].mxu1 }
 0x4b0   :  { %v1106_v39 = vmul.f32 10.0, %v1582_v60 }
 0x4b2   :  { %v1107_v40 = vmul.f32 1.442695, %v1106_v39 }
 0x4b4   :  { %1902 = vpow2.f32 %v1107_v40 }
 0x4be   :  { %v2584_v41 = vpop.eup %1902 }
 0x4bf LB: > { %vm1126_vm0 = vcmask 1041408   ;;  %v1120_v29 = vrot.slane %v1938_v42, 6  ;;  %v1122_v44 = vrot.slane %v1938_v42, 4  ;;  %v1124_v45 = vrot.slane %v1938_v42, 2  ;;  %s1947_s23 = smov 123   ;;  %s1948_s24 = smov 5   ;;  %s1942_s4 = sphi %s2588_s4, %s1318_s4   ;;  %v1938_v42 = vphi %v2586_v42, %v2682_v42  }
 0x4c0   : > { %vm1128_vm1 = vcmask 1043456   ;;  %vm1130_vm2 = vcmask 1045504   ;;  %vm1144_vm3 = vcmask 39936   ;;  %s1318_s4 = sadd.s32 5, %s1942_s4  }
 0x4c1   : > { %v1127_v46 = vsel %vm1126_vm0, %v1938_v42, %v1120_v29  ;;  %p1113_p0 = scmp.lt.s32.totalorder %s1318_s4, 100 }
 0x4c2   : > { %v1129_v62 = vsel %vm1128_vm1, %v1127_v46, %v1122_v44 }
 0x4c3   : > { %v1131_v63 = vsel %vm1130_vm2, %v1129_v62, %v1124_v45 }
 0x4c4   : > { %v1132_v0 = vmul.f32 %v2584_v41, %v1131_v63 }
 0x4c6   : > { %1134 = vrot.lane.b32.xlu0 %v1132_v0, %s1947_s23 }
 0x538   : > { %v1135_v3 = vpop.permute.xlu0 %1134 }
 0x539   : > { %v1137_v61 = vadd.f32 %v1135_v3, %v1132_v0 }
 0x53b   : > { %1904 = vrcp.f32 %v1137_v61 }
 0x545   : > { %v1905_v4 = vpop.eup %1904 }
 0x546   : > { %v1139_v6 = vmul.f32 0.25, %v1905_v4 }
 0x548   : > { %1141 = vrot.lane.b32.xlu0 %v1139_v6, %s1948_s24 }
 0x5ba   : > { %v1142_v7 = vpop.permute.xlu0 %1141 }
 0x5bb   : > { %v1145_v8 = vsel %vm1144_vm3, %v1139_v6, %v1142_v7 }
 0x5bc   : > { %v1146_v43 = vmul.f32 %v2584_v41, %v1145_v8 }
 0x5be   : > { %v1148_v48 = vrot.slane %v1146_v43, 2  ;;  %v1151_v9 = vrot.slane %v1146_v43, 4  ;;  %v1154_v11 = vrot.slane %v1146_v43, 6 }
 0x5c0   : > { %v1150_v49 = vadd.f32 %v1148_v48, %v1146_v43 }
 0x5c2   : > { %v1153_v10 = vadd.f32 %v1151_v9, %v1150_v49 }
 0x5c4   : > { %v1156_v16 = vadd.f32 %v1154_v11, %v1153_v10 }
 0x5c6   : > { %1906 = vrcp.f32 %v1156_v16 }
 0x5d0   : > { %v1907_v17 = vpop.eup %1906 }
 0x5d1   : > { %v1158_v26 = vmul.f32 0.5, %v1907_v17 }
 0x5d3   : > { %v1160_v18 = vrot.slane %v1158_v26, 6  ;;  %v1162_v19 = vrot.slane %v1158_v26, 4  ;;  %v1164_v20 = vrot.slane %v1158_v26, 2 }
 0x5d5   : > { %v1166_v21 = vsel %vm1126_vm0, %v1158_v26, %v1160_v18 }
 0x5d6   : > { %v1167_v14 = vsel %vm1128_vm1, %v1166_v21, %v1162_v19 }
 0x5d7   : > { %v1168_v15 = vsel %vm1130_vm2, %v1167_v14, %v1164_v20 }
 0x5d8   : > { %v1169_v22 = vmul.f32 %v2584_v41, %v1168_v15 }
 0x5da   : > { %1171 = vrot.lane.b32.xlu1 %v1169_v22, %s1947_s23 }
 0x64c   : > { %v1172_v24 = vpop.permute.xlu1 %1171 }
 0x64d   : > { %v1174_v1 = vadd.f32 %v1172_v24, %v1169_v22 }
 0x64f   : > { %1908 = vrcp.f32 %v1174_v1 }
 0x659   : > { %v1909_v25 = vpop.eup %1908 }
 0x65a   : > { %v1176_v27 = vmul.f32 0.25, %v1909_v25 }
 0x65c   : > { %1178 = vrot.lane.b32.xlu1 %v1176_v27, %s1948_s24 }
 0x6ce   : > { %v1179_v2 = vpop.permute.xlu1 %1178 }
 0x6cf   : > { %v1181_v30 = vsel %vm1144_vm3, %v1176_v27, %v1179_v2 }
 0x6d0   : > { %v1182_v31 = vmul.f32 %v2584_v41, %v1181_v30 }
 0x6d2   : > { %v1184_v32 = vrot.slane %v1182_v31, 2  ;;  %v1187_v12 = vrot.slane %v1182_v31, 4  ;;  %v1190_v28 = vrot.slane %v1182_v31, 6 }
 0x6d4   : > { %v1186_v33 = vadd.f32 %v1184_v32, %v1182_v31 }
 0x6d6   : > { %v1189_v13 = vadd.f32 %v1187_v12, %v1186_v33 }
 0x6d8   : > { %v1192_v23 = vadd.f32 %v1190_v28, %v1189_v13 }
 0x6da   : > { %1910 = vrcp.f32 %v1192_v23 }
 0x6e4   : > { %v1911_v36 = vpop.eup %1910 }
 0x6e5   : > { %v1194_v37 = vmul.f32 0.5, %v1911_v36 }
 0x6e7   : > { %v1196_v47 = vrot.slane %v1194_v37, 6  ;;  %v1198_v50 = vrot.slane %v1194_v37, 4  ;;  %v1200_v51 = vrot.slane %v1194_v37, 2 }
 0x6e9   : > { %v1202_v53 = vsel %vm1126_vm0, %v1194_v37, %v1196_v47 }
 0x6ea   : > { %v1203_v52 = vsel %vm1128_vm1, %v1202_v53, %v1198_v50 }
 0x6eb   : > { %v1204_v54 = vsel %vm1130_vm2, %v1203_v52, %v1200_v51 }
 0x6ec   : > { %v1205_v55 = vmul.f32 %v2584_v41, %v1204_v54 }
 0x6ee   : > { %1207 = vrot.lane.b32.xlu0 %v1205_v55, %s1947_s23 }
 0x760   : > { %v1208_v57 = vpop.permute.xlu0 %1207 }
 0x761   : > { %v1210_v58 = vadd.f32 %v1208_v57, %v1205_v55 }
 0x763   : > { %1912 = vrcp.f32 %v1210_v58 }
 0x76d   : > { %v1913_v60 = vpop.eup %1912 }
 0x76e   : > { %v1212_v38 = vmul.f32 0.25, %v1913_v60 }
 0x770   : > { %1214 = vrot.lane.b32.xlu1 %v1212_v38, %s1948_s24 }
 0x7e2   : > { %v1215_v39 = vpop.permute.xlu1 %1214 }
 0x7e3   : > { %v1217_v40 = vsel %vm1144_vm3, %v1212_v38, %v1215_v39 }
 0x7e4   : > { %v1218_v42 = vmul.f32 %v2584_v41, %v1217_v40 }
 0x7e6   : > { %v1220_v29 = vrot.slane %v1218_v42, 2  ;;  %v1223_v45 = vrot.slane %v1218_v42, 4  ;;  %v1226_v62 = vrot.slane %v1218_v42, 6 }
 0x7e8   : > { %v1222_v44 = vadd.f32 %v1220_v29, %v1218_v42 }
 0x7ea   : > { %v1225_v46 = vadd.f32 %v1223_v45, %v1222_v44 }
 0x7ec   : > { %v1228_v63 = vadd.f32 %v1226_v62, %v1225_v46 }
 0x7ee   : > { %1914 = vrcp.f32 %v1228_v63 }
 0x7f8   : > { %v1915_v0 = vpop.eup %1914 }
 0x7f9   : > { %v1230_v3 = vmul.f32 0.5, %v1915_v0 }
 0x7fb   : > { %v1232_v61 = vrot.slane %v1230_v3, 6  ;;  %v1234_v4 = vrot.slane %v1230_v3, 4  ;;  %v1236_v6 = vrot.slane %v1230_v3, 2 }
 0x7fd   : > { %v1238_v7 = vsel %vm1126_vm0, %v1230_v3, %v1232_v61 }
 0x7fe   : > { %v1239_v8 = vsel %vm1128_vm1, %v1238_v7, %v1234_v4 }
 0x7ff   : > { %v1240_v43 = vsel %vm1130_vm2, %v1239_v8, %v1236_v6 }
 0x800   : > { %v1241_v48 = vmul.f32 %v2584_v41, %v1240_v43 }
 0x802   : > { %1243 = vrot.lane.b32.xlu0 %v1241_v48, %s1947_s23 }
 0x874   : > { %v1244_v49 = vpop.permute.xlu0 %1243 }
 0x875   : > { %v1246_v9 = vadd.f32 %v1244_v49, %v1241_v48 }
 0x877   : > { %1916 = vrcp.f32 %v1246_v9 }
 0x881   : > { %v1917_v10 = vpop.eup %1916 }
 0x882   : > { %v1248_v11 = vmul.f32 0.25, %v1917_v10 }
 0x884   : > { %1250 = vrot.lane.b32.xlu1 %v1248_v11, %s1948_s24 }
 0x8f6   : > { %v1251_v16 = vpop.permute.xlu1 %1250 }
 0x8f7   : > { %v1253_v17 = vsel %vm1144_vm3, %v1248_v11, %v1251_v16 }
 0x8f8   : > { %v1254_v26 = vmul.f32 %v2584_v41, %v1253_v17 }
 0x8fa   : > { %v1256_v18 = vrot.slane %v1254_v26, 2  ;;  %v1259_v20 = vrot.slane %v1254_v26, 4  ;;  %v1262_v14 = vrot.slane %v1254_v26, 6 }
 0x8fc   : > { %v1258_v19 = vadd.f32 %v1256_v18, %v1254_v26 }
 0x8fe   : > { %v1261_v21 = vadd.f32 %v1259_v20, %v1258_v19 }
 0x900   : > { %v1264_v15 = vadd.f32 %v1262_v14, %v1261_v21 }
 0x902   : > { %1918 = vrcp.f32 %v1264_v15 }
 0x90c   : > { %v1919_v22 = vpop.eup %1918 }
 0x90d   : > { %v1266_v24 = vmul.f32 0.5, %v1919_v22 }
 0x90f   : > { %v1268_v1 = vrot.slane %v1266_v24, 6  ;;  %v1270_v25 = vrot.slane %v1266_v24, 4  ;;  %v1272_v27 = vrot.slane %v1266_v24, 2 }
 0x911   : > { %v1274_v2 = vsel %vm1126_vm0, %v1266_v24, %v1268_v1 }
 0x912   : > { %v1275_v30 = vsel %vm1128_vm1, %v1274_v2, %v1270_v25 }
 0x913   : > { %v1276_v31 = vsel %vm1130_vm2, %v1275_v30, %v1272_v27 }
 0x914   : > { %v1277_v32 = vmul.f32 %v2584_v41, %v1276_v31 }
 0x916   : > { %1279 = vrot.lane.b32.xlu0 %v1277_v32, %s1947_s23 }
 0x988   : > { %v1280_v33 = vpop.permute.xlu0 %1279 }
 0x989   : > { %v1282_v12 = vadd.f32 %v1280_v33, %v1277_v32 }
 0x98b   : > { %1920 = vrcp.f32 %v1282_v12 }
 0x995   : > { %v1921_v13 = vpop.eup %1920 }
 0x996   : > { %v1284_v28 = vmul.f32 0.25, %v1921_v13 }
 0x998   : > { %1286 = vrot.lane.b32.xlu0 %v1284_v28, %s1948_s24  ;;  %v1303_v23 = vsub.f32 %v1284_v28, %v1248_v11 }
 0x99a   : > { %v1304_v36 = vand.u32 2147483647, %v1303_v23 }
 0x99c   : > { %v1305_v37 = vsel %vm1144_vm3, %v1304_v36, 0.0 }
 0x99d   : > { %1306 = vadd.xlane.f32.xlu1 %v1305_v37 }
 0xa0a   : > { %v1287_v47 = vpop.permute.xlu0 %1286 }
 0xa0b   : > { %v1289_v50 = vsel %vm1144_vm3, %v1284_v28, %v1287_v47 }
 0xa0c   : > { %v1290_v51 = vmul.f32 %v2584_v41, %v1289_v50 }
 0xa0e   : > { %v1292_v53 = vrot.slane %v1290_v51, 2  ;;  %v1295_v54 = vrot.slane %v1290_v51, 4  ;;  %v1298_v57 = vrot.slane %v1290_v51, 6 }
 0xa10   : > { %v1294_v52 = vadd.f32 %v1292_v53, %v1290_v51 }
 0xa12   : > { %v1297_v55 = vadd.f32 %v1295_v54, %v1294_v52 }
 0xa14   : > { %v1300_v58 = vadd.f32 %v1298_v57, %v1297_v55 }
 0xa16   : > { %1922 = vrcp.f32 %v1300_v58 }
 0xa20   : > { %v1923_v60 = vpop.eup %1922 }
 0xa21   : > { %v1302_v38 = vmul.f32 0.5, %v1923_v60  }
 0xa2a   : > { %v1307_v39 = vpop.xlane.xlu1 %1306 }
 0xa2b   : > { %v1308_v40 = vrot.slane %v1307_v39, 4 }
 0xa2d   : > { %v1309_v42 = vadd.f32 %v1308_v40, %v1307_v39 }
 0xa2f   : > { %v1310_v29 = vrot.slane %v1309_v42, 2 }
 0xa31   : > { %v1311_v44 = vadd.f32 %v1310_v29, %v1309_v42  ;;  %v2682_v42 = vmov %v1302_v38 }
 0xa33   : > { %v1312_v45 = vrot.slane %v1311_v44, 1 }
 0xa35   : > { %v1313_v46 = vadd.f32 %v1312_v45, %v1311_v44 }
 0xa37   : > { %1866 = vpush %v1313_v46 }
 0xa68   : > { %s1867_s25 = spop %1866 }
 0xa69   : > { %s1317_s26 = smul.f32 0.025, %s1867_s25 }
 0xa6b   : > { %p1114_p1 = scmp.ge.f32.partialorder %s1317_s26, 0.01 }
 0xa6d   : > { %p1115_p2 = pnand %p1114_p1, %p1113_p0 }
 0xa6e   :  { %v1320_v62 = vrot.slane (%p1115_p2), %v1302_v38, 6  ;;  %v1322_v63 = vrot.slane (%p1115_p2), %v1302_v38, 4  ;;  %v1324_v0 = vrot.slane (%p1115_p2), %v1302_v38, 2  ;;  %1738 = vmatprep.subr.mxu1 (%p1115_p2), %v1946_v35  ;;  %1740 = vmatprep.mubr.msk.f32.mxu1 (%p1115_p2), %vm2681_vm14, %v1946_v35  ;;  %s1949_s27 = smov (%p1115_p2), 123   ;;  %s1950_s28 = smov (%p1115_p2), 5   ;;  %v1375_v20 = vand.u32 (%p1115_p2), 127, %v130_v56 }
 0xa6f   :  { %1118 = sbr.rel (!%p1115_p2) target bundleno = 1215 (0x4bf), region = 51  ;;  %v1377_v21 = vadd.s32 (%p1115_p2), 2, %v2132_v5  ;;  %v1380_v14 = vadd.s32 (%p1115_p2), 4, %v2132_v5  ;;  %v1390_v15 = vadd.s32 (%p1115_p2), 8, %v2132_v5  ;;  %v1383_v24 = vadd.s32 (%p1115_p2), 6, %v2132_v5  ;;  %s1556_s29 = sld [smem:[#allocation2]] (%p1115_p2) }
 0xa70   :  { %v1327_v3 = vsel (%p1115_p2), %vm1126_vm0, %v1302_v38, %v1320_v62  ;;  %vm1376_vm4 = vcmp.eq.s32.totalorder (%p1115_p2), %v1375_v20, %v2132_v5  ;;  %v1393_v22 = vadd.s32 (%p1115_p2), 5, %v1375_v20  ;;  %vm1398_vm13 = vcmp.lt.s32.totalorder (%p1115_p2), %v1375_v20, 5 }
 0xa71   :  { %v1329_v61 = vsel (%p1115_p2), %vm1128_vm1, %v1327_v3, %v1322_v63  ;;  %vm1378_vm5 = vcmp.eq.s32.totalorder (%p1115_p2), %v1375_v20, %v1377_v21  ;;  %vm1381_vm7 = vcmp.eq.s32.totalorder (%p1115_p2), %v1375_v20, %v1380_v14  ;;  %vm1392_vm8 = vcmp.eq.s32.totalorder (%p1115_p2), %v1390_v15, %v1375_v20 }
 0xa72   :  { %v1331_v4 = vsel (%p1115_p2), %vm1130_vm2, %v1329_v61, %v1324_v0  ;;  %vm1379_vm6 = vmor (%p1115_p2), %vm1376_vm4, %vm1378_vm5  ;;  %vm1395_vm9 = vcmp.eq.s32.totalorder (%p1115_p2), %v1390_v15, %v1393_v22  ;;  %vm1384_vm11 = vcmp.eq.s32.totalorder (%p1115_p2), %v1375_v20, %v1383_v24  ;;  %vm1391_vm15 = vcmp.eq.s32.totalorder (%p1115_p2), %v2132_v5, %v1375_v20 }
 0xa73   :  { %v1332_v6 = vmul.f32 (%p1115_p2), %v2584_v41, %v1331_v4  ;;  %vm1382_vm10 = vmor (%p1115_p2), %vm1379_vm6, %vm1381_vm7  ;;  %vm1386_vm4 = vcmp.lt.s32.totalorder (%p1115_p2), %v2132_v5, 2  ;;  %v1951_v36 = vmov (%p1115_p2), 1.0  }
 0xa74   :  { %vm1397_vm12 = vmor (%p1115_p2), %vm1392_vm8, %vm1395_vm9 }
 0xa75   :  { %1334 = vrot.lane.b32.xlu0 (%p1115_p2), %v1332_v6, %s1949_s27  ;;  %vm1385_vm14 = vmor (%p1115_p2), %vm1382_vm10, %vm1384_vm11 }
 0xa76   :  { %vm1400_vm5 = vmand %vm1397_vm12, %vm1398_vm13 }
 0xa77   :  { %vm1387_vm7 = vmand %vm1385_vm14, %vm1386_vm4  ;;  %v1585_v12 = vsel %vm1400_vm5, 1.0, %v1946_v35  ;;  %vm2683_vm14 = vmmov 0  }
 0xa78   :  { %v1583_v23 = vsel %vm1387_vm7, 1.0, %v1946_v35 }
 0xae7   :  { %v1335_v7 = vpop.permute.xlu0 %1334 }
 0xae8   :  { %v1337_v8 = vadd.f32 %v1335_v7, %v1332_v6 }
 0xaea   :  { %1924 = vrcp.f32 %v1337_v8 }
 0xaf4   :  { %v1925_v43 = vpop.eup %1924 }
 0xaf5   :  { %v1339_v48 = vmul.f32 0.25, %v1925_v43 }
 0xaf7   :  { %1341 = vrot.lane.b32.xlu0 %v1339_v48, %s1950_s28 }
 0xb69   :  { %v1342_v49 = vpop.permute.xlu0 %1341 }
 0xb6a   :  { %v1345_v9 = vsel %vm1144_vm3, %v1339_v48, %v1342_v49  ;;  %vm1394_vm3 = vcmp.eq.s32.totalorder %v2132_v5, %v1393_v22  ;;  %v1863_v5 = vpack.c.bf16 %v1585_v12, %v1951_v36 }
 0xb6b   :  { %v1346_v10 = vmul.f32 %v2584_v41, %v1345_v9  ;;  %vm1396_vm6 = vmor %vm1391_vm15, %vm1394_vm3 }
 0xb6c   :  { %vm1399_vm8 = vmand %vm1396_vm6, %vm1398_vm13 }
 0xb6d   :  { %v1348_v11 = vrot.slane %v1346_v10, 2  ;;  %v1351_v17 = vrot.slane %v1346_v10, 4  ;;  %v1354_v18 = vrot.slane %v1346_v10, 6  ;;  %vm1864_vm9 = vmpackc.low %vm1126_vm0, %vm1399_vm8 }
 0xb6f   :  { %v1350_v16 = vadd.f32 %v1348_v11, %v1346_v10 }
 0xb71   :  { %v1353_v26 = vadd.f32 %v1351_v17, %v1350_v16 }
 0xb73   :  { %v1356_v19 = vadd.f32 %v1354_v18, %v1353_v26 }
 0xb75   :  { %1926 = vrcp.f32 %v1356_v19 }
 0xb7f   :  { %v1927_v1 = vpop.eup %1926 }
 0xb80   :  { %v1358_v25 = vmul.f32 0.5, %v1927_v1 }
 0xb82   :  { %v1360_v56 = vrot.slane %v1358_v25, 6  ;;  %v1362_v27 = vrot.slane %v1358_v25, 4  ;;  %v1364_v2 = vrot.slane %v1358_v25, 2 }
 0xb84   :  { %v1366_v30 = vsel %vm1126_vm0, %v1358_v25, %v1360_v56 }
 0xb85   :  { %v1367_v31 = vsel %vm1128_vm1, %v1366_v30, %v1362_v27  ;;  %vm1405_vm1 = vcmask 64512  }
 0xb86   :  { %v1368_v32 = vsel %vm1130_vm2, %v1367_v31, %v1364_v2  ;;  %vm1479_vm2 = vcmask 80896  }
 0xb87   :  { %v1369_v33 = vmul.f32 %v1368_v32, %v1345_v9 }
 0xb89   :  { %v1370_v13 = vmul.f32 %v2584_v41, %v1369_v33 }
 0xb8b   :  { %v1371_v28 = vmul.f32 %v1370_v13, %v2581_v59  ;;  %v1557_v59 = vstv %s1556_s29 }
 0xb8d   :  { %1739 = vmatpush3.msra.mxu1 %v1371_v28 }
 0xb8e   :  { %1741 = vmatmul.mubr.msk.f32.vlgmr.msra.gmra.mrb[8].mxu1 %vm1405_vm1, %v1583_v23  ;;  %1862 = vmatprep.subr.bf16.mxu1 %v1944_v34 }
 0xb8f   :  { %1865 = vmatpush3.bf16.msk.msra.mxu1 %vm1864_vm9, %v1863_v5  ;;  %1747 = vmatprep.mubr.msk.f32.mxu1 %vm2683_vm14, %v1946_v35 }
 0xc61   :  { %v1475_v41 = vpop.f32.mrb[8].mxu1 }
 0xc62   :  { %v1742_v37 = vpop.f32.mrb[9].mxu1  ;;  %1748 = vmatmul.mubr.msk.f32.vlgmr.msra.gmra.mrb[10].mxu1 %vm1479_vm2, %v1475_v41 }
 0xd35   :  { %v1552_v47 = vpop.f32.mrb[10].mxu1 }
 0xd36   :  { %v1558_v50 = vmul.f32 %v1557_v59, %v1552_v47  ;;  %v1749_v51 = vpop.f32.mrb[11].mxu1 }
 0xd38   :  { %1559 = vst [vmem:[%s2676_s6] sm:$0xff] %v1558_v50 }

</bundles_post_ra>
